<compile_context>
chip_gen: v6e
topology: v6e:2x2x1
jax: 0.10.0
libtpu: 0.0.40
codegen_flags: <defaults>
</compile_context>

<pallas_src>
import functools

import jax
import jax.numpy as jnp
import numpy as np
from jax.experimental import pallas as pl
from jax.experimental.pallas import tpu as pltpu


def _mha_kernel(x_ref, wqkv_ref, bqkv_ref, wo_ref, bo_ref, o_ref, *, num_heads):
    # x_ref: (B, C, L) f32 -- native channel-major layout of the module.
    xb = x_ref[...].astype(jnp.bfloat16)                       # bf16 cast in-kernel
    B, C, L = xb.shape
    H = num_heads
    d = C // H
    G = B * H

    # Fused QKV projection on the MXU (bf16 inputs, f32 accumulation).
    # 1/sqrt(d) is already folded into the Q rows of wqkv/bqkv.
    wqkv_b = jnp.broadcast_to(wqkv_ref[...], (B, 3 * C, C))    # tiny, VMEM-resident
    qkv = jnp.einsum("brc,bcl->brl", wqkv_b, xb,
                     preferred_element_type=jnp.float32)       # (B, 3C, L) f32
    qkv = qkv + bqkv_ref[...]                                  # bias (3C, 1) broadcast over L

    # Head split: channels -> (H, d) is a sublane-aligned split (d = 8).
    qh = qkv[:, 0 * C:1 * C, :].reshape(G, d, L).astype(jnp.bfloat16)
    kh = qkv[:, 1 * C:2 * C, :].reshape(G, d, L).astype(jnp.bfloat16)
    vh = qkv[:, 2 * C:3 * C, :].reshape(G, d, L).astype(jnp.bfloat16)

    # Scores: contraction over d; dot_general output order matches -> no transpose.
    s = jnp.einsum("gdq,gdk->gqk", qh, kh,
                   preferred_element_type=jnp.float32)         # (G, L, L) f32
    s = s - jnp.max(s, axis=-1, keepdims=True)
    p = jnp.exp(s)
    denom = jnp.sum(p, axis=-1)                                # (G, L) f32, unnormalized

    # PV matmul on UNNORMALIZED probabilities; normalize the small context after.
    ctx = jnp.einsum("gdk,gqk->gdq", vh, p.astype(jnp.bfloat16),
                     preferred_element_type=jnp.float32)       # (G, d, L) f32
    ctx = ctx * pl.reciprocal(denom, approx=True)[:, None, :]

    # Merge heads back to channels (pure contiguous reshape, head-concat order).
    attn = ctx.reshape(B, C, L).astype(jnp.bfloat16)

    # Output projection, still channel-major.
    wo_b = jnp.broadcast_to(wo_ref[...], (B, C, C))
    out = jnp.einsum("brc,bcl->brl", wo_b, attn,
                     preferred_element_type=jnp.float32) + bo_ref[...]   # (B, C, L)

    o_ref[...] = out.astype(o_ref.dtype)


def multihead_self_attention(x_bcl, kparams, num_heads):
    """x_bcl: (B, C, L) float32 (channel-major). Returns (B, C, L) float32."""
    B, C, L = x_bcl.shape
    wqkv, bqkv, wo, bo = kparams
    assert C % num_heads == 0

    kernel = functools.partial(_mha_kernel, num_heads=num_heads)
    full2 = lambda a: pl.BlockSpec(a.shape, lambda i: (0, 0))

    return pl.pallas_call(
        kernel,
        out_shape=jax.ShapeDtypeStruct((B, C, L), jnp.float32),
        grid_spec=pltpu.PrefetchScalarGridSpec(
            num_scalar_prefetch=0,
            grid=(1,),                                  # single step: whole batch
            in_specs=[
                pl.BlockSpec((B, C, L), lambda i: (0, 0, 0)),   # x (f32, native layout)
                full2(wqkv),                                    # (3C, C) bf16
                full2(bqkv),                                    # (3C, 1) f32
                full2(wo),                                      # (C, C)  bf16
                full2(bo),                                      # (C, 1)  f32
            ],
            out_specs=pl.BlockSpec((B, C, L), lambda i: (0, 0, 0)),
        ),
        compiler_params=pltpu.CompilerParams(
            dimension_semantics=("arbitrary",)),
    )(x_bcl, wqkv, bqkv, wo, bo)


def self_attention_forward(x_nchw, kparams, num_heads):
    """Replicates SelfAttention.forward: NCHW -> seq attention -> NCHW.
    Both reshapes are contiguous (free); all transposes live inside the kernel's
    channel-major math."""
    B, C, W, H = x_nchw.shape
    y_bcl = multihead_self_attention(x_nchw.reshape(B, C, W * H), kparams, num_heads)
    return y_bcl.reshape(B, C, W, H)


def make_params(key, C):
    """Deterministic init mirroring nn.MultiheadAttention parameter shapes:
    in_proj_weight (3C, C), in_proj_bias (3C,), out_proj.weight (C, C),
    out_proj.bias (C,). Kept in PyTorch layout (channel-major math uses W directly)."""
    k1, k2 = jax.random.split(key)
    bound = float(np.sqrt(6.0 / (C + 3 * C)))  # xavier_uniform over (3C, C)
    in_proj_w = jax.random.uniform(k1, (3 * C, C), jnp.float32, -bound, bound)
    in_proj_b = jnp.zeros((3 * C,), jnp.float32)
    ob = float(np.sqrt(1.0 / C))
    out_proj_w = jax.random.uniform(k2, (C, C), jnp.float32, -ob, ob)
    out_proj_b = jnp.zeros((C,), jnp.float32)
    return (in_proj_w, in_proj_b, out_proj_w, out_proj_b)


def prepare_kernel_params(params, num_heads):
    """Fold 1/sqrt(head_dim) into the Q rows of the fused in-projection and cast
    MXU operands to bf16 (biases stay f32: added post-accumulation, shaped (·,1)
    to broadcast over the lane (L) axis of the channel-major layout)."""
    in_w, in_b, out_w, out_b = params
    C = out_w.shape[0]
    scale = 1.0 / float(np.sqrt(C // num_heads))
    wqkv = jnp.concatenate([in_w[:C] * scale, in_w[C:]], axis=0)      # (3C, C)
    bqkv = jnp.concatenate([in_b[:C] * scale, in_b[C:]], axis=0)      # (3C,)
    return (wqkv.astype(jnp.bfloat16),
            bqkv.reshape(3 * C, 1).astype(jnp.float32),
            out_w.astype(jnp.bfloat16),
            out_b.reshape(C, 1).astype(jnp.float32))


def reference_forward(x_nchw, params, num_heads):
    """Pure-JAX f32 reference of nn.MultiheadAttention(x, x, x) over spatial tokens."""
    in_w, in_b, out_w, out_b = params
    B, C, W, H = x_nchw.shape
    L = W * H
    x = jnp.transpose(x_nchw.reshape(B, C, L), (0, 2, 1))  # (B, L, C) tokens
    q = x @ in_w[0 * C:1 * C].T + in_b[0 * C:1 * C]
    k = x @ in_w[1 * C:2 * C].T + in_b[1 * C:2 * C]
    v = x @ in_w[2 * C:3 * C].T + in_b[2 * C:3 * C]
    d = C // num_heads
    qh = q.reshape(B, L, num_heads, d).transpose(0, 2, 1, 3)
    kh = k.reshape(B, L, num_heads, d).transpose(0, 2, 1, 3)
    vh = v.reshape(B, L, num_heads, d).transpose(0, 2, 1, 3)
    s = jnp.einsum("bhqd,bhkd->bhqk", qh, kh) / np.sqrt(d)
    p = jax.nn.softmax(s, axis=-1)
    o = jnp.einsum("bhqk,bhkd->bhqd", p, vh)
    o = o.transpose(0, 2, 1, 3).reshape(B, L, C)
    y = o @ out_w.T + out_b
    return jnp.transpose(y, (0, 2, 1)).reshape(B, C, W, H)


if __name__ == "__main__":
    B, C, W, H = 2, 32, 8, 8
    NUM_HEADS = 4

    key = jax.random.PRNGKey(0)
    kx, kp = jax.random.split(key)
    x = jax.random.normal(kx, (B, C, W, H), jnp.float32)
    params = make_params(kp, C)
    kparams = prepare_kernel_params(params, NUM_HEADS)

    out = self_attention_forward(x, kparams, NUM_HEADS)
    out = jax.block_until_ready(out)

    ref = reference_forward(x, params, NUM_HEADS)
    # bf16 MXU operands + approx reciprocal -> compare at bf16-level tolerance.
    np.testing.assert_allclose(np.asarray(out), np.asarray(ref),
                               rtol=2e-2, atol=2e-2)
    assert out.shape == (B, C, W, H)
    print("KERNEL_OK")
</pallas_src>

<mosaic_0001>
module attributes {stable_mosaic.version = 11 : i64} {
  func.func @_mha_kernel(%arg0: i32, %arg1: memref<2x32x64xf32, #tpu.memory_space<vmem>>, %arg2: memref<96x32xbf16, #tpu.memory_space<vmem>>, %arg3: memref<96x1xf32, #tpu.memory_space<vmem>>, %arg4: memref<32x32xbf16, #tpu.memory_space<vmem>>, %arg5: memref<32x1xf32, #tpu.memory_space<vmem>>, %arg6: memref<2x32x64xf32, #tpu.memory_space<vmem>>) attributes {dimension_semantics = [#tpu.dimension_semantics<arbitrary>], iteration_bounds = array<i64: 1>, scalar_prefetch = 0 : i64, scratch_operands = 0 : i64, tpu.core_type = #tpu.core_type<tc>, window_params = [{pipeline_mode = #tpu.pipeline_mode<synchronous>, transform_indices = @transform_0, window_bounds = array<i64: 2, 32, 64>}, {pipeline_mode = #tpu.pipeline_mode<synchronous>, transform_indices = @transform_1, window_bounds = array<i64: 96, 32>}, {pipeline_mode = #tpu.pipeline_mode<synchronous>, transform_indices = @transform_2, window_bounds = array<i64: 96, 1>}, {pipeline_mode = #tpu.pipeline_mode<synchronous>, transform_indices = @transform_3, window_bounds = array<i64: 32, 32>}, {pipeline_mode = #tpu.pipeline_mode<synchronous>, transform_indices = @transform_4, window_bounds = array<i64: 32, 1>}, {pipeline_mode = #tpu.pipeline_mode<synchronous>, transform_indices = @transform_5, window_bounds = array<i64: 2, 32, 64>}]} {
    %c0 = arith.constant 0 : index
    %c0_0 = arith.constant 0 : index
    %c0_1 = arith.constant 0 : index
    %0 = vector.load %arg1[%c0, %c0_0, %c0_1] : memref<2x32x64xf32, #tpu.memory_space<vmem>>, vector<2x32x64xf32>
    %1 = arith.truncf %0 : vector<2x32x64xf32> to vector<2x32x64xbf16>
    %c0_2 = arith.constant 0 : index
    %c0_3 = arith.constant 0 : index
    %2 = vector.load %arg2[%c0_2, %c0_3] : memref<96x32xbf16, #tpu.memory_space<vmem>>, vector<96x32xbf16>
    %3 = vector.shape_cast %2 : vector<96x32xbf16> to vector<1x96x32xbf16>
    %4 = vector.broadcast %3 : vector<1x96x32xbf16> to vector<2x96x32xbf16>
    "tpu.trace_start"() <{level = 10 : i32, message = "brc,bcl->brl"}> : () -> ()
    %cst = arith.constant dense<0.000000e+00> : vector<2x96x64xf32>
    %5 = tpu.matmul %4, %1, %cst {dimension_numbers = #tpu.dot_dimension_numbers<[2], [1], [1], [2], [0, 0, 0, 1, 1, 2], [0], [0]>} : vector<2x96x32xbf16>, vector<2x32x64xbf16>, vector<2x96x64xf32> -> vector<2x96x64xf32>
    "tpu.trace_stop"() : () -> ()
    %c0_4 = arith.constant 0 : index
    %c0_5 = arith.constant 0 : index
    %6 = vector.load %arg3[%c0_4, %c0_5] : memref<96x1xf32, #tpu.memory_space<vmem>>, vector<96x1xf32>
    %7 = vector.shape_cast %6 : vector<96x1xf32> to vector<1x96x1xf32>
    %8 = vector.broadcast %7 : vector<1x96x1xf32> to vector<2x96x64xf32>
    %9 = arith.addf %5, %8 : vector<2x96x64xf32>
    %10 = vector.extract_strided_slice %9 {offsets = [0, 0, 0], sizes = [2, 32, 64], strides = [1, 1, 1]} : vector<2x96x64xf32> to vector<2x32x64xf32>
    %11 = vector.shape_cast %10 : vector<2x32x64xf32> to vector<8x8x64xf32>
    %12 = arith.truncf %11 : vector<8x8x64xf32> to vector<8x8x64xbf16>
    %13 = vector.extract_strided_slice %9 {offsets = [0, 32, 0], sizes = [2, 32, 64], strides = [1, 1, 1]} : vector<2x96x64xf32> to vector<2x32x64xf32>
    %14 = vector.shape_cast %13 : vector<2x32x64xf32> to vector<8x8x64xf32>
    %15 = arith.truncf %14 : vector<8x8x64xf32> to vector<8x8x64xbf16>
    %16 = vector.extract_strided_slice %9 {offsets = [0, 64, 0], sizes = [2, 32, 64], strides = [1, 1, 1]} : vector<2x96x64xf32> to vector<2x32x64xf32>
    %17 = vector.shape_cast %16 : vector<2x32x64xf32> to vector<8x8x64xf32>
    %18 = arith.truncf %17 : vector<8x8x64xf32> to vector<8x8x64xbf16>
    "tpu.trace_start"() <{level = 10 : i32, message = "gdq,gdk->gqk"}> : () -> ()
    %cst_6 = arith.constant dense<0.000000e+00> : vector<8x64x64xf32>
    %19 = tpu.matmul %12, %15, %cst_6 {dimension_numbers = #tpu.dot_dimension_numbers<[1], [1], [2], [2], [0, 0, 0, 2, 1, 2], [0], [0]>} : vector<8x8x64xbf16>, vector<8x8x64xbf16>, vector<8x64x64xf32> -> vector<8x64x64xf32>
    "tpu.trace_stop"() : () -> ()
    %cst_7 = arith.constant dense<0xFF800000> : vector<8x64xf32>
    %20 = vector.multi_reduction <maximumf>, %19, %cst_7 [2] : vector<8x64x64xf32> to vector<8x64xf32>
    %21 = vector.shape_cast %20 : vector<8x64xf32> to vector<8x64x1xf32>
    %22 = vector.broadcast %21 : vector<8x64x1xf32> to vector<8x64x64xf32>
    %23 = arith.subf %19, %22 : vector<8x64x64xf32>
    %24 = math.exp %23 : vector<8x64x64xf32>
    %cst_8 = arith.constant dense<0.000000e+00> : vector<8x64xf32>
    %25 = vector.multi_reduction <add>, %24, %cst_8 [2] : vector<8x64x64xf32> to vector<8x64xf32>
    %26 = arith.truncf %24 : vector<8x64x64xf32> to vector<8x64x64xbf16>
    "tpu.trace_start"() <{level = 10 : i32, message = "gdk,gqk->gdq"}> : () -> ()
    %cst_9 = arith.constant dense<0.000000e+00> : vector<8x8x64xf32>
    %27 = tpu.matmul %18, %26, %cst_9 {dimension_numbers = #tpu.dot_dimension_numbers<[2], [2], [1], [1], [0, 0, 0, 1, 1, 1], [0], [0]>} : vector<8x8x64xbf16>, vector<8x64x64xbf16>, vector<8x8x64xf32> -> vector<8x8x64xf32>
    "tpu.trace_stop"() : () -> ()
    %28 = tpu.reciprocal %25 {approx = true} : vector<8x64xf32> -> vector<8x64xf32>
    %29 = vector.shape_cast %28 : vector<8x64xf32> to vector<8x1x64xf32>
    %30 = vector.broadcast %29 : vector<8x1x64xf32> to vector<8x8x64xf32>
    %31 = arith.mulf %27, %30 : vector<8x8x64xf32>
    %32 = vector.shape_cast %31 : vector<8x8x64xf32> to vector<2x32x64xf32>
    %33 = arith.truncf %32 : vector<2x32x64xf32> to vector<2x32x64xbf16>
    %c0_10 = arith.constant 0 : index
    %c0_11 = arith.constant 0 : index
    %34 = vector.load %arg4[%c0_10, %c0_11] : memref<32x32xbf16, #tpu.memory_space<vmem>>, vector<32x32xbf16>
    %35 = vector.shape_cast %34 : vector<32x32xbf16> to vector<1x32x32xbf16>
    %36 = vector.broadcast %35 : vector<1x32x32xbf16> to vector<2x32x32xbf16>
    "tpu.trace_start"() <{level = 10 : i32, message = "brc,bcl->brl"}> : () -> ()
    %cst_12 = arith.constant dense<0.000000e+00> : vector<2x32x64xf32>
    %37 = tpu.matmul %36, %33, %cst_12 {dimension_numbers = #tpu.dot_dimension_numbers<[2], [1], [1], [2], [0, 0, 0, 1, 1, 2], [0], [0]>} : vector<2x32x32xbf16>, vector<2x32x64xbf16>, vector<2x32x64xf32> -> vector<2x32x64xf32>
    "tpu.trace_stop"() : () -> ()
    %c0_13 = arith.constant 0 : index
    %c0_14 = arith.constant 0 : index
    %38 = vector.load %arg5[%c0_13, %c0_14] : memref<32x1xf32, #tpu.memory_space<vmem>>, vector<32x1xf32>
    %39 = vector.shape_cast %38 : vector<32x1xf32> to vector<1x32x1xf32>
    %40 = vector.broadcast %39 : vector<1x32x1xf32> to vector<2x32x64xf32>
    %41 = arith.addf %37, %40 : vector<2x32x64xf32>
    %c0_15 = arith.constant 0 : index
    %c0_16 = arith.constant 0 : index
    %c0_17 = arith.constant 0 : index
    %42 = vector.load %arg6[%c0_15, %c0_16, %c0_17] : memref<2x32x64xf32, #tpu.memory_space<vmem>>, vector<2x32x64xf32>
    tpu.vector_store %arg6[%c0_15, %c0_16, %c0_17], %41 {strides = array<i32>} : memref<2x32x64xf32, #tpu.memory_space<vmem>>, vector<2x32x64xf32>,
    return
  }
  func.func @transform_0(%arg0: i32) -> (i32, i32, i32) {
    %c0_i32 = arith.constant 0 : i32
    %c0_i32_0 = arith.constant 0 : i32
    %c0_i32_1 = arith.constant 0 : i32
    %c0_i32_2 = arith.constant 0 : i32
    return %c0_i32, %c0_i32_0, %c0_i32_1 : i32, i32, i32
  }
  func.func @transform_1(%arg0: i32) -> (i32, i32) {
    %c0_i32 = arith.constant 0 : i32
    %c0_i32_0 = arith.constant 0 : i32
    %c0_i32_1 = arith.constant 0 : i32
    return %c0_i32, %c0_i32_0 : i32, i32
  }
  func.func @transform_2(%arg0: i32) -> (i32, i32) {
    %c0_i32 = arith.constant 0 : i32
    %c0_i32_0 = arith.constant 0 : i32
    %c0_i32_1 = arith.constant 0 : i32
    return %c0_i32, %c0_i32_0 : i32, i32
  }
  func.func @transform_3(%arg0: i32) -> (i32, i32) {
    %c0_i32 = arith.constant 0 : i32
    %c0_i32_0 = arith.constant 0 : i32
    %c0_i32_1 = arith.constant 0 : i32
    return %c0_i32, %c0_i32_0 : i32, i32
  }
  func.func @transform_4(%arg0: i32) -> (i32, i32) {
    %c0_i32 = arith.constant 0 : i32
    %c0_i32_0 = arith.constant 0 : i32
    %c0_i32_1 = arith.constant 0 : i32
    return %c0_i32, %c0_i32_0 : i32, i32
  }
  func.func @transform_5(%arg0: i32) -> (i32, i32, i32) {
    %c0_i32 = arith.constant 0 : i32
    %c0_i32_0 = arith.constant 0 : i32
    %c0_i32_1 = arith.constant 0 : i32
    %c0_i32_2 = arith.constant 0 : i32
    return %c0_i32, %c0_i32_0, %c0_i32_1 : i32, i32, i32
  }
}

</mosaic_0001>

<bundles_post_ra>
// kernel: tpu_custom_call.1
= control target key start
LH: loop header
LB: loop body
LE: loop exit
PB: predicated region body
PF: predicated region fallthrough
CT: control target
= control target key end

     0   :  { %v3562_v7 = vmov 0   ;;  %vm148_vm0 = vcmask 261120   ;;  %s4650_s0 = inlined_call_operand.vmem [shape: f32[2,32,64], index: 0, kind: input, shape index: {}]   ;;  %s4651_s1 = inlined_call_operand.vmem [shape: bf16[96,32], index: 1, kind: input, shape index: {}]   ;;  %s4652_s2 = inlined_call_operand.vmem [shape: f32[96,1], index: 2, kind: input, shape index: {}]   ;;  %s4653_s3 = inlined_call_operand.vmem [shape: bf16[32,32], index: 3, kind: input, shape index: {}]   ;;  %s4654_s4 = inlined_call_operand.vmem [shape: f32[32,1], index: 4, kind: input, shape index: {}]   ;;  %s4655_s5 = inlined_call_operand.hbm [shape: f32[2,32,64], index: 5, kind: output, shape index: {}]  }
   0x1   :  { %v24_v0 = vld [vmem:[%s4650_s0 + $0x10] sm:$0xff]  ;;  %v25_v1 = vld [vmem:[%s4650_s0 + $0x18] sm:$0xff]  ;;  %v22_v5 = vld [vmem:[%s4650_s0] sm:$0xff]  ;;  %3274 = vset.pattern.permute.xlu0 %v3562_v7  ;;  %3275 = vset.pattern.permute.xlu1 %v3562_v7 }
   0x2   :  { %v28_v2 = vld [vmem:[%s4650_s0 + $0x30] sm:$0xff]  ;;  %v31_v3 = vpack.c.bf16 %v25_v1, %v24_v0  ;;  %v29_v4 = vld [vmem:[%s4650_s0 + $0x38] sm:$0xff]  ;;  %v23_v6 = vld [vmem:[%s4650_s0 + $0x8] sm:$0xff] }
   0x3   :  { %v33_v8 = vpack.c.bf16 %v29_v4, %v28_v2  ;;  %v30_v9 = vpack.c.bf16 %v23_v6, %v22_v5  ;;  %v26_v10 = vld [vmem:[%s4650_s0 + $0x20] sm:$0xff]  ;;  %v27_v11 = vld [vmem:[%s4650_s0 + $0x28] sm:$0xff]  ;;  %v48_v16 = vld [vmem:[%s4652_s2 + $0x10] sm:$0xff] }
   0x4   :  { %3036 = vmatprep.subr.bf16.mxu0 %v31_v3  ;;  %v32_v12 = vpack.c.bf16 %v27_v11, %v26_v10  ;;  %v3276_v13 = vld [vmem:[%s4651_s1] sm:$0xff]   ;;  %v3277_v15 = vld [vmem:[%s4651_s1 + $0x8] sm:$0xff]   ;;  %v3278_v17 = vld [vmem:[%s4651_s1 + $0x10] sm:$0xff]   ;;  %70 = vperm.xlu1 %3275, %v48_v16  }
   0x5   :  { %3052 = vmatprep.subr.bf16.mxu1 %v33_v8  ;;  %3037 = vmatpush3.bf16.msra.mxu0 %v31_v3  ;;  %v46_v14 = vld [vmem:[%s4652_s2] sm:$0xff]  ;;  %v47_v18 = vld [vmem:[%s4652_s2 + $0x8] sm:$0xff]  ;;  %v49_v19 = vld [vmem:[%s4652_s2 + $0x18] sm:$0xff] }
   0x6   :  { %3053 = vmatpush3.bf16.msra.mxu1 %v33_v8  ;;  %3038 = vmatprep.subr.bf16.mxu0 %v30_v9  ;;  %v50_v20 = vld [vmem:[%s4652_s2 + $0x20] sm:$0xff] }
   0x7   :  { %3054 = vmatprep.subr.bf16.mxu1 %v32_v12  ;;  %3040 = vmatprep.mubr.msk.bf16.mxu0 %vm148_vm0, %v3276_v13 }
   0x8   :  { %3056 = vmatprep.mubr.msk.bf16.mxu1 %vm148_vm0, %v3276_v13  ;;  %60 = vperm.xlu0 %3274, %v46_v14  }
   0x9   :  { %3039 = vmatpush3.bf16.msra.mxu0 %v30_v9 }
   0xa   :  { %3055 = vmatpush3.bf16.msra.mxu1 %v32_v12 }
   0xc   :  { %3041 = vmatmul.mubr.msk.bf16.vlgmr.msra.gmra.mxu0 %vm148_vm0, %v3277_v15  ;;  %65 = vperm.xlu0 %3274, %v47_v18  }
   0xd   :  { %3057 = vmatmul.mubr.msk.bf16.vlgmr.msra.gmra.mxu1 %vm148_vm0, %v3277_v15  ;;  %3044 = vmatprep.mubr.msk.bf16.mxu0 %vm148_vm0, %v3278_v17 }
   0xe   :  { %10 = vsyncpa [#allocation3], 0  ;;  %3060 = vmatprep.mubr.msk.bf16.mxu1 %vm148_vm0, %v3278_v17  ;;  %75 = vperm.xlu1 %3275, %v49_v19   ;;  %v51_v21 = vld [vmem:[%s4652_s2 + $0x28] sm:$0xff]  ;;  %v3279_v22 = vld [vmem:[%s4651_s1 + $0x18] sm:$0xff]   ;;  %vm382_vm1 = vcmask 1043456   ;;  %vm369_vm2 = vcmask 64512  }
   0xf   :  { %v52_v23 = vld [vmem:[%s4652_s2 + $0x30] sm:$0xff]  ;;  %v3280_v24 = vld [vmem:[%s4651_s1 + $0x20] sm:$0xff]   ;;  %v53_v25 = vld [vmem:[%s4652_s2 + $0x38] sm:$0xff]  ;;  %vm1123_vm3 = vcmask 523264   ;;  %vm3564_vm4 = vmmov 0   ;;  %vm2311_vm5 = vcmask 130112  }
  0x10   :  { %80 = vperm.xlu0 %3274, %v50_v20   ;;  %v3281_v26 = vld [vmem:[%s4651_s1 + $0x28] sm:$0xff]   ;;  %v54_v9 = vld [vmem:[%s4652_s2 + $0x40] sm:$0xff]  ;;  %vm2318_vm6 = vcmask 195712   ;;  %vm2325_vm7 = vcmask 261312   ;;  %vm2332_vm8 = vcmask 326912   ;;  %vm2339_vm9 = vcmask 392512  }
  0x11   :  { %v55_v10 = vld [vmem:[%s4652_s2 + $0x48] sm:$0xff]  ;;  %vm2346_vm10 = vcmask 458112   ;;  %vm2353_vm11 = vcmask 523712  }
  0x12   :  { %85 = vperm.xlu1 %3275, %v51_v21  }
  0x14   :  { %3045 = vmatmul.mubr.msk.bf16.gmra.mxu0 %vm148_vm0, %v3279_v22  ;;  %90 = vperm.xlu0 %3274, %v52_v23  }
  0x15   :  { %3061 = vmatmul.mubr.msk.bf16.gmra.mxu1 %vm148_vm0, %v3279_v22  ;;  %3048 = vmatprep.mubr.msk.bf16.mxu0 %vm148_vm0, %v3280_v24 }
  0x16   :  { %95 = vperm.xlu1 %3275, %v53_v25   ;;  %3064 = vmatprep.mubr.msk.bf16.mxu1 %vm148_vm0, %v3280_v24 }
  0x1c   :  { %3049 = vmatmul.mubr.msk.bf16.gmra.mxu0 %vm148_vm0, %v3281_v26 }
  0x1d   :  { %3065 = vmatmul.mubr.msk.bf16.gmra.mxu1 %vm148_vm0, %v3281_v26 }
  0x7f   :  { %v71_v28 = vpop.permute.xlu1 %70 }
  0x83   :  { %v61_v27 = vpop.permute.xlu0 %60 }
  0x87   :  { %v66_v29 = vpop.permute.xlu0 %65 }
  0x89   :  { %v76_v31 = vpop.permute.xlu1 %75 }
  0x8b   :  { %v3676_v33 = vpop.permute.xlu0 %80 }
  0x8d   :  { %v3678_v36 = vpop.permute.xlu1 %85 }
  0x8f   :  { %v3680_v41 = vpop.permute.xlu0 %90 }
  0x91   :  { %v3682_v44 = vpop.permute.xlu1 %95 }
  0xcc   :  { %v3042_v30 = vpop.f32.mrf.mxu0 }
  0xcd   :  { %v210_v50 = vadd.f32 %v3042_v30, %v71_v28  ;;  %v3058_v55 = vpop.f32.mrf.mxu1 }
  0xce   :  { %v201_v32 = vpop.f32.mrf.mxu0  ;;  %v291_v5 = vadd.f32 %v3058_v55, %v71_v28 }
  0xcf   :  { %v202_v34 = vadd.f32 %v201_v32, %v61_v27  ;;  %v331_v58 = vpack.c.bf16 %v210_v50, %v210_v50  ;;  %v282_v61 = vpop.f32.mrf.mxu1 }
  0xd0   :  { %v3043_v35 = vpop.f32.mrf.mxu0  ;;  %v283_v0 = vadd.f32 %v282_v61, %v61_v27  ;;  %v335_v6 = vpack.c.bf16 %v291_v5, %v291_v5 }
  0xd1   :  { %v329_v37 = vpack.c.bf16 %v202_v34, %v202_v34  ;;  %v213_v59 = vadd.f32 %v3043_v35, %v76_v31  ;;  %v3059_v63 = vpop.f32.mrf.mxu1 }
  0xd2   :  { %v204_v38 = vpop.f32.mrf.mxu0  ;;  %v333_v2 = vpack.c.bf16 %v283_v0, %v283_v0  ;;  %v294_v7 = vadd.f32 %v3059_v63, %v76_v31 }
  0xd3   :  { %v205_v39 = vadd.f32 %v204_v38, %v66_v29  ;;  %353 = vxpose.xlu0.c.b16.start.end [1/1] (short) (narrow) %v329_v37, 64  ;;  %v332_v62 = vpack.c.bf16 %v213_v59, %v213_v59  ;;  %v285_v1 = vpop.f32.mrf.mxu1 }
  0xd4   :  { %v3046_v40 = vpop.f32.mrf.mxu0  ;;  %v286_v3 = vadd.f32 %v285_v1, %v66_v29  ;;  %v336_v8 = vpack.c.bf16 %v294_v7, %v294_v7 }
  0xd5   :  { %v330_v42 = vpack.c.bf16 %v205_v39, %v205_v39  ;;  %v226_v45 = vadd.f32 %v3046_v40, %v3680_v41  ;;  %v3062_v11 = vpop.f32.mrf.mxu1 }
  0xd6   :  { %v217_v43 = vpop.f32.mrf.mxu0  ;;  %v334_v4 = vpack.c.bf16 %v286_v3, %v286_v3  ;;  %v307_v30 = vadd.f32 %v3062_v11, %v3680_v41 }
  0xd7   :  { %v218_v46 = vadd.f32 %v217_v43, %v3676_v33  ;;  %451 = vxpose.xlu1.c.b16.start.end [1/1] (short) (narrow) %v330_v42, 64  ;;  %v339_v52 = vpack.c.bf16 %v226_v45, %v226_v45  ;;  %v298_v12 = vpop.f32.mrf.mxu1 }
  0xd8   :  { %v3047_v47 = vpop.f32.mrf.mxu0  ;;  %v299_v15 = vadd.f32 %v298_v12, %v3676_v33  ;;  %v343_v33 = vpack.c.bf16 %v307_v30, %v307_v30 }
  0xd9   :  { %v337_v48 = vpack.c.bf16 %v218_v46, %v218_v46  ;;  %v229_v49 = vadd.f32 %v3047_v47, %v3682_v44  ;;  %v3063_v13 = vpop.f32.mrf.mxu1  ;;  %v576_v19 = vsel %vm382_vm1, %v339_v52, 0 }
  0xda   :  { %v220_v51 = vpop.f32.mrf.mxu0  ;;  %v341_v20 = vpack.c.bf16 %v299_v15, %v299_v15  ;;  %v310_v35 = vadd.f32 %v3063_v13, %v3682_v44  ;;  %v960_v46 = vsel %vm382_vm1, %v343_v33, 0 }
  0xdb   :  { %v384_v53 = vsel %vm382_vm1, %v337_v48, 0  ;;  %3260 = vmatprep.subr.msk.bf16.mxu0 %vm382_vm1, %v337_v48  ;;  %v221_v54 = vadd.f32 %v220_v51, %v3678_v36  ;;  %v340_v57 = vpack.c.bf16 %v229_v49, %v229_v49  ;;  %v301_v16 = vpop.f32.mrf.mxu1 }
  0xdc   :  { %3069 = vmatpush3.bf16.msra.mxu0 %v384_v53  ;;  %v302_v21 = vadd.f32 %v301_v16, %v3678_v36  ;;  %v768_v34 = vsel %vm382_vm1, %v341_v20, 0  ;;  %v344_v38 = vpack.c.bf16 %v310_v35, %v310_v35  ;;  %v3746_v61 = vpop.f32.mrf.mxu0 }
  0xdd   :  { %3262 = vmatprep.subr.msk.bf16.mxu0 %vm382_vm1, %v339_v52  ;;  %v338_v56 = vpack.c.bf16 %v221_v54, %v221_v54  ;;  %v672_v25 = vsel %vm382_vm1, %v340_v57, 0  ;;  %4677 = vst [vmem:[#allocation5_spill] sm:$0xff] %v3746_v61 }
  0xde   :  { %v342_v24 = vpack.c.bf16 %v302_v21, %v302_v21  ;;  %v1056_v49 = vsel %vm382_vm1, %v344_v38, 0  ;;  %v3750_v63 = vpop.f32.mrf.mxu0 }
  0xdf   :  { %v480_v60 = vsel %vm382_vm1, %v338_v56, 0  ;;  %3261 = vmatprep.subr.msk.bf16.mxu1 %vm382_vm1, %v338_v56 }
  0xe0   :  { %547 = vxpose.xlu0.c.b16.start.end [1/1] (short) (narrow) %v331_v58, 64  ;;  %3079 = vmatpush3.bf16.msra.mxu1 %v480_v60  ;;  %v864_v39 = vsel %vm382_vm1, %v342_v24, 0  ;;  %v3754_v1 = vpop.f32.mrf.mxu0 }
  0xe1   :  { %3263 = vmatprep.subr.msk.bf16.mxu1 %vm382_vm1, %v340_v57  ;;  %4680 = vst [vmem:[#allocation8_spill] sm:$0xff] %v3754_v1 }
  0xe2   :  { %v3758_v3 = vpop.f32.mrf.mxu0 }
  0xe4   :  { %643 = vxpose.xlu1.c.b16.start.end [1/1] (short) (narrow) %v332_v62, 64  ;;  %v3748_v62 = vpop.f32.mrf.mxu1 }
  0xe5   :  { %4678 = vst [vmem:[#allocation6_spill] sm:$0xff] %v3748_v62 }
  0xe6   :  { %v3752_v0 = vpop.f32.mrf.mxu1 }
  0xe7   :  { %4679 = vst [vmem:[#allocation7_spill] sm:$0xff] %v3752_v0 }
  0xed   :  { %739 = vxpose.xlu0.c.b16.start.end [1/1] (short) (narrow) %v333_v2, 64  ;;  %v3756_v2 = vpop.f32.mrf.mxu1 }
  0xee   :  { %4681 = vst [vmem:[#allocation9_spill] sm:$0xff] %v3756_v2 }
  0xf1   :  { %835 = vxpose.xlu1.c.b16.start.end [1/1] (short) (narrow) %v334_v4, 64 }
  0xfa   :  { %931 = vxpose.xlu0.c.b16.start.end [1/1] (short) (narrow) %v335_v6, 64  ;;  %v3764_v6 = vpop.f32.mrf.mxu1 }
  0xfb   :  { %4682 = vst [vmem:[#allocation10_spill] sm:$0xff] %v3764_v6 }
  0xfe   :  { %1027 = vxpose.xlu1.c.b16.start.end [1/1] (short) (narrow) %v336_v8, 64 }
 0x10e   :  { %100 = vperm.xlu1 %3275, %v54_v9  }
 0x10f   :  { %105 = vperm.xlu0 %3274, %v55_v10  }
 0x135   :  { %v361_v14 = vpop.trf.xlu0 }
 0x136   :  { %3070 = vmatprep.mubr.msk.bf16.mxu0 %vm369_vm2, %v361_v14 }
 0x139   :  { %v459_v17 = vpop.trf.xlu1  ;;  %v362_v18 = vpop.trf.xlu0 }
 0x13a   :  { %3071 = vmatmul.mubr.msk.bf16.vlgmr.msra.gmra.mxu0 %vm369_vm2, %v362_v18  ;;  %3080 = vmatprep.mubr.msk.bf16.mxu1 %vm369_vm2, %v459_v17 }
 0x13b   :  { %3089 = vmatpush3.bf16.msra.mxu0 %v576_v19 }
 0x13c   :  { %3264 = vmatprep.subr.msk.bf16.mxu0 %vm382_vm1, %v341_v20 }
 0x13d   :  { %v460_v22 = vpop.trf.xlu1  ;;  %v363_v23 = vpop.trf.xlu0 }
 0x13e   :  { %3081 = vmatmul.mubr.msk.bf16.vlgmr.msra.gmra.mxu1 %vm369_vm2, %v460_v22  ;;  %3074 = vmatprep.mubr.msk.bf16.mxu0 %vm369_vm2, %v363_v23 }
 0x13f   :  { %3099 = vmatpush3.bf16.msra.mxu1 %v672_v25 }
 0x140   :  { %3265 = vmatprep.subr.msk.bf16.mxu1 %vm382_vm1, %v342_v24 }
 0x141   :  { %v461_v26 = vpop.trf.xlu1  ;;  %v364_v27 = vpop.trf.xlu0 }
 0x142   :  { %3075 = vmatmul.mubr.msk.bf16.gmra.mxu0 %vm369_vm2, %v364_v27  ;;  %3084 = vmatprep.mubr.msk.bf16.mxu1 %vm369_vm2, %v461_v26 }
 0x145   :  { %v462_v28 = vpop.trf.xlu1  ;;  %v555_v29 = vpop.trf.xlu0 }
 0x146   :  { %3085 = vmatmul.mubr.msk.bf16.gmra.mxu1 %vm369_vm2, %v462_v28  ;;  %3090 = vmatprep.mubr.msk.bf16.mxu0 %vm369_vm2, %v555_v29 }
 0x149   :  { %v651_v31 = vpop.trf.xlu1  ;;  %v556_v32 = vpop.trf.xlu0 }
 0x14a   :  { %3091 = vmatmul.mubr.msk.bf16.vlgmr.msra.gmra.mxu0 %vm369_vm2, %v556_v32  ;;  %3100 = vmatprep.mubr.msk.bf16.mxu1 %vm369_vm2, %v651_v31 }
 0x14b   :  { %3109 = vmatpush3.bf16.msra.mxu0 %v768_v34 }
 0x14c   :  { %3266 = vmatprep.subr.msk.bf16.mxu0 %vm382_vm1, %v343_v33 }
 0x14d   :  { %v652_v36 = vpop.trf.xlu1  ;;  %v557_v37 = vpop.trf.xlu0 }
 0x14e   :  { %3101 = vmatmul.mubr.msk.bf16.vlgmr.msra.gmra.mxu1 %vm369_vm2, %v652_v36  ;;  %3094 = vmatprep.mubr.msk.bf16.mxu0 %vm369_vm2, %v557_v37 }
 0x14f   :  { %3119 = vmatpush3.bf16.msra.mxu1 %v864_v39 }
 0x150   :  { %3267 = vmatprep.subr.msk.bf16.mxu1 %vm382_vm1, %v344_v38 }
 0x151   :  { %v653_v40 = vpop.trf.xlu1  ;;  %v558_v41 = vpop.trf.xlu0 }
 0x152   :  { %3095 = vmatmul.mubr.msk.bf16.gmra.mxu0 %vm369_vm2, %v558_v41  ;;  %3104 = vmatprep.mubr.msk.bf16.mxu1 %vm369_vm2, %v653_v40 }
 0x155   :  { %v654_v42 = vpop.trf.xlu1  ;;  %v747_v43 = vpop.trf.xlu0 }
 0x156   :  { %3105 = vmatmul.mubr.msk.bf16.gmra.mxu1 %vm369_vm2, %v654_v42  ;;  %3110 = vmatprep.mubr.msk.bf16.mxu0 %vm369_vm2, %v747_v43 }
 0x159   :  { %v843_v44 = vpop.trf.xlu1  ;;  %v748_v45 = vpop.trf.xlu0 }
 0x15a   :  { %3111 = vmatmul.mubr.msk.bf16.vlgmr.msra.gmra.mxu0 %vm369_vm2, %v748_v45  ;;  %3120 = vmatprep.mubr.msk.bf16.mxu1 %vm369_vm2, %v843_v44 }
 0x15b   :  { %3129 = vmatpush3.bf16.msra.mxu0 %v960_v46 }
 0x15d   :  { %v844_v47 = vpop.trf.xlu1  ;;  %v749_v48 = vpop.trf.xlu0 }
 0x15e   :  { %3121 = vmatmul.mubr.msk.bf16.vlgmr.msra.gmra.mxu1 %vm369_vm2, %v844_v47  ;;  %3114 = vmatprep.mubr.msk.bf16.mxu0 %vm369_vm2, %v749_v48 }
 0x15f   :  { %3139 = vmatpush3.bf16.msra.mxu1 %v1056_v49 }
 0x161   :  { %v845_v50 = vpop.trf.xlu1  ;;  %v750_v51 = vpop.trf.xlu0 }
 0x162   :  { %3115 = vmatmul.mubr.msk.bf16.gmra.mxu0 %vm369_vm2, %v750_v51  ;;  %3124 = vmatprep.mubr.msk.bf16.mxu1 %vm369_vm2, %v845_v50 }
 0x165   :  { %v846_v52 = vpop.trf.xlu1  ;;  %v939_v53 = vpop.trf.xlu0 }
 0x166   :  { %3125 = vmatmul.mubr.msk.bf16.gmra.mxu1 %vm369_vm2, %v846_v52  ;;  %3130 = vmatprep.mubr.msk.bf16.mxu0 %vm369_vm2, %v939_v53 }
 0x169   :  { %v1035_v54 = vpop.trf.xlu1  ;;  %v940_v55 = vpop.trf.xlu0 }
 0x16a   :  { %3131 = vmatmul.mubr.msk.bf16.vlgmr.msra.gmra.mxu0 %vm369_vm2, %v940_v55  ;;  %3140 = vmatprep.mubr.msk.bf16.mxu1 %vm369_vm2, %v1035_v54 }
 0x16d   :  { %v1036_v56 = vpop.trf.xlu1  ;;  %v941_v57 = vpop.trf.xlu0 }
 0x16e   :  { %3141 = vmatmul.mubr.msk.bf16.vlgmr.msra.gmra.mxu1 %vm369_vm2, %v1036_v56  ;;  %3134 = vmatprep.mubr.msk.bf16.mxu0 %vm369_vm2, %v941_v57 }
 0x171   :  { %v1037_v58 = vpop.trf.xlu1  ;;  %v942_v59 = vpop.trf.xlu0 }
 0x172   :  { %3135 = vmatmul.mubr.msk.bf16.gmra.mxu0 %vm369_vm2, %v942_v59  ;;  %3144 = vmatprep.mubr.msk.bf16.mxu1 %vm369_vm2, %v1037_v58 }
 0x175   :  { %v1038_v60 = vpop.trf.xlu1 }
 0x176   :  { %3145 = vmatmul.mubr.msk.bf16.gmra.mxu1 %vm369_vm2, %v1038_v60 }
 0x189   :  { %v3974_v62 = vpop.permute.xlu1 %100 }
 0x18a   :  { %v3982_v1 = vpop.permute.xlu0 %105 }
 0x1fa   :  { %v3760_v4 = vpop.f32.mrf.mxu0 }
 0x1fb   :  { %v1130_v5 = vsel %vm1123_vm3, %v3760_v4, -inf }
 0x1fc   :  { %1131 = vmax.xlane.f32.xlu1 %v1130_v5  ;;  %v3766_v7 = vpop.f32.mrf.mxu0 }
 0x1fd   :  { %v1124_v10 = vsel %vm1123_vm3, %v3766_v7, -inf }
 0x1fe   :  { %v3768_v8 = vpop.f32.mrf.mxu0  ;;  %v3770_v9 = vpop.f32.mrf.mxu1 }
 0x1ff   :  { %v1133_v11 = vsel %vm1123_vm3, %v3768_v8, -inf  ;;  %v1154_v13 = vsel %vm1123_vm3, %v3770_v9, -inf }
 0x200   :  { %1125 = vmax.xlane.f32.xlu1 %v1124_v10  ;;  %1134 = vmax.xlane.f32.xlu0 %v1133_v11  ;;  %v3776_v12 = vpop.f32.mrf.mxu0  ;;  %v3780_v14 = vpop.f32.mrf.mxu1 }
 0x201   :  { %v1127_v15 = vsel %vm1123_vm3, %v3776_v12, -inf  ;;  %v1148_v17 = vsel %vm1123_vm3, %v3780_v14, -inf }
 0x202   :  { %v3784_v16 = vpop.f32.mrf.mxu0  ;;  %v3790_v19 = vpop.f32.mrf.mxu1 }
 0x203   :  { %v1142_v18 = vsel %vm1123_vm3, %v3784_v16, -inf  ;;  %v1157_v22 = vsel %vm1123_vm3, %v3790_v19, -inf }
 0x204   :  { %1155 = vmax.xlane.f32.xlu1 %v1154_v13  ;;  %1128 = vmax.xlane.f32.xlu0 %v1127_v15  ;;  %v3792_v20 = vpop.f32.mrf.mxu0  ;;  %v3794_v21 = vpop.f32.mrf.mxu1  ;;  %v4656_v13 = vmov 0.0  }
 0x205   :  { %v1136_v23 = vsel %vm1123_vm3, %v3792_v20, -inf  ;;  %v1151_v26 = vsel %vm1123_vm3, %v3794_v21, -inf  ;;  %3148 = vmatprep.subr.bf16.mxu0 %v4656_v13  ;;  %3160 = vmatprep.subr.bf16.mxu1 %v4656_v13 }
 0x206   :  { %v3800_v24 = vpop.f32.mrf.mxu0  ;;  %v3802_v25 = vpop.f32.mrf.mxu1  ;;  %3156 = vmatprep.mubr.msk.bf16.mxu0 %vm3564_vm4, %v4656_v13  ;;  %3168 = vmatprep.mubr.msk.bf16.mxu1 %vm3564_vm4, %v4656_v13 }
 0x207   :  { %v1145_v27 = vsel %vm1123_vm3, %v3800_v24, -inf  ;;  %v1166_v30 = vsel %vm1123_vm3, %v3802_v25, -inf }
 0x208   :  { %1149 = vmax.xlane.f32.xlu1 %v1148_v17  ;;  %1143 = vmax.xlane.f32.xlu0 %v1142_v18  ;;  %v3808_v28 = vpop.f32.mrf.mxu0  ;;  %v3810_v29 = vpop.f32.mrf.mxu1 }
 0x209   :  { %v1160_v31 = vsel %vm1123_vm3, %v3810_v29, -inf  ;;  %v1139_v36 = vsel %vm1123_vm3, %v3808_v28, -inf }
 0x20a   :  { %v3816_v32 = vpop.f32.mrf.mxu0  ;;  %v3818_v33 = vpop.f32.mrf.mxu1 }
 0x20b   :  { %v1178_v35 = vsel %vm1123_vm3, %v3816_v32, -inf  ;;  %v1169_v41 = vsel %vm1123_vm3, %v3818_v33, -inf }
 0x20c   :  { %1158 = vmax.xlane.f32.xlu0 %v1157_v22  ;;  %1137 = vmax.xlane.f32.xlu1 %v1136_v23  ;;  %v3820_v34 = vpop.f32.mrf.mxu0  ;;  %v3826_v37 = vpop.f32.mrf.mxu1 }
 0x20d   :  { %v1172_v39 = vsel %vm1123_vm3, %v3820_v34, -inf  ;;  %v1163_v46 = vsel %vm1123_vm3, %v3826_v37, -inf }
 0x20e   :  { %v3828_v38 = vpop.f32.mrf.mxu0  ;;  %v3832_v40 = vpop.f32.mrf.mxu1 }
 0x20f   :  { %v1202_v43 = vsel %vm1123_vm3, %v3832_v40, -inf  ;;  %v1181_v49 = vsel %vm1123_vm3, %v3828_v38, -inf }
 0x210   :  { %1152 = vmax.xlane.f32.xlu0 %v1151_v26  ;;  %1146 = vmax.xlane.f32.xlu1 %v1145_v27  ;;  %v3836_v42 = vpop.f32.mrf.mxu0  ;;  %v3840_v44 = vpop.f32.mrf.mxu1 }
 0x211   :  { %v1196_v48 = vsel %vm1123_vm3, %v3840_v44, -inf  ;;  %v1175_v53 = vsel %vm1123_vm3, %v3836_v42, -inf }
 0x212   :  { %v3842_v45 = vpop.f32.mrf.mxu0  ;;  %v3852_v50 = vpop.f32.mrf.mxu1 }
 0x213   :  { %v1190_v52 = vsel %vm1123_vm3, %v3842_v45, -inf  ;;  %v1205_v59 = vsel %vm1123_vm3, %v3852_v50, -inf }
 0x214   :  { %1167 = vmax.xlane.f32.xlu0 %v1166_v30  ;;  %1161 = vmax.xlane.f32.xlu1 %v1160_v31  ;;  %v3846_v47 = vpop.f32.mrf.mxu0  ;;  %v3860_v54 = vpop.f32.mrf.mxu1 }
 0x215   :  { %v1184_v56 = vsel %vm1123_vm3, %v3846_v47, -inf  ;;  %v1199_v11 = vsel %vm1123_vm3, %v3860_v54, -inf }
 0x216   :  { %v3854_v51 = vpop.f32.mrf.mxu0  ;;  %v3866_v57 = vpop.f32.mrf.mxu1 }
 0x217   :  { %v1214_v5 = vsel %vm1123_vm3, %v3866_v57, -inf  ;;  %v1193_v22 = vsel %vm1123_vm3, %v3854_v51, -inf }
 0x218   :  { %1140 = vmax.xlane.f32.xlu0 %v1139_v36  ;;  %1179 = vmax.xlane.f32.xlu1 %v1178_v35  ;;  %v3862_v55 = vpop.f32.mrf.mxu0  ;;  %v3872_v60 = vpop.f32.mrf.mxu1 }
 0x219   :  { %v1208_v17 = vsel %vm1123_vm3, %v3872_v60, -inf  ;;  %v1187_v31 = vsel %vm1123_vm3, %v3862_v55, -inf }
 0x21a   :  { %v3868_v58 = vpop.f32.mrf.mxu0  ;;  %v3882_v15 = vpop.f32.mrf.mxu1 }
 0x21b   :  { %v1226_v26 = vsel %vm1123_vm3, %v3868_v58, -inf }
 0x21c   :  { %1170 = vmax.xlane.f32.xlu0 %v1169_v41  ;;  %1173 = vmax.xlane.f32.xlu1 %v1172_v39  ;;  %v3876_v10 = vpop.f32.mrf.mxu0  ;;  %v3890_v23 = vpop.f32.mrf.mxu1  ;;  %v1217_v41 = vsel %vm1123_vm3, %v3882_v15, -inf }
 0x21d   :  { %4683 = vst [vmem:[#allocation11_spill] sm:$0xff] %v3876_v10 }
 0x21e   :  { %v3886_v18 = vpop.f32.mrf.mxu0  ;;  %v3894_v27 = vpop.f32.mrf.mxu1 }
 0x21f   :  { %4684 = vst [vmem:[#allocation12_spill] sm:$0xff] %v3886_v18  ;;  %4685 = vst [vmem:[#allocation13_spill] sm:$0xff] %v3894_v27  ;;  %v1250_v36 = vsel %vm1123_vm3, %v3894_v27, -inf }
 0x220   :  { %1164 = vmax.xlane.f32.xlu0 %v1163_v46  ;;  %1203 = vmax.xlane.f32.xlu1 %v1202_v43  ;;  %v3896_v30 = vpop.f32.mrf.mxu0  ;;  %v3900_v35 = vpop.f32.mrf.mxu1 }
 0x221   :  { %4686 = vst [vmem:[#allocation14_spill] sm:$0xff] %v3896_v30  ;;  %4687 = vst [vmem:[#allocation15_spill] sm:$0xff] %v3900_v35  ;;  %v1244_v0 = vsel %vm1123_vm3, %v3900_v35, -inf  ;;  %v1223_v35 = vsel %vm1123_vm3, %v3896_v30, -inf }
 0x222   :  { %v3904_v39 = vpop.f32.mrf.mxu0  ;;  %v3908_v43 = vpop.f32.mrf.mxu1 }
 0x223   :  { %4688 = vst [vmem:[#allocation16_spill] sm:$0xff] %v3904_v39  ;;  %4689 = vst [vmem:[#allocation17_spill] sm:$0xff] %v3908_v43  ;;  %v1238_v46 = vsel %vm1123_vm3, %v3904_v39, -inf }
 0x224   :  { %1197 = vmax.xlane.f32.xlu1 %v1196_v48  ;;  %1182 = vmax.xlane.f32.xlu0 %v1181_v49  ;;  %v3912_v48 = vpop.f32.mrf.mxu0  ;;  %v1211_v49 = vsel %vm1123_vm3, %v3890_v23, -inf }
 0x225   :  { %4690 = vst [vmem:[#allocation18_spill] sm:$0xff] %v3912_v48 }
 0x228   :  { %1176 = vmax.xlane.f32.xlu0 %v1175_v53  ;;  %1191 = vmax.xlane.f32.xlu1 %v1190_v52  ;;  %v3916_v52 = vpop.f32.mrf.mxu1  ;;  %v1232_v53 = vsel %vm1123_vm3, %v3912_v48, -inf }
 0x229   :  { %4691 = vst [vmem:[#allocation19_spill] sm:$0xff] %v3916_v52 }
 0x22c   :  { %1206 = vmax.xlane.f32.xlu0 %v1205_v59  ;;  %1185 = vmax.xlane.f32.xlu1 %v1184_v56  ;;  %v3920_v56 = vpop.f32.mrf.mxu1  ;;  %v1229_v59 = vsel %vm1123_vm3, %v3886_v18, -inf }
 0x22d   :  { %4692 = vst [vmem:[#allocation20_spill] sm:$0xff] %v3920_v56 }
 0x230   :  { %1200 = vmax.xlane.f32.xlu0 %v1199_v11  ;;  %1215 = vmax.xlane.f32.xlu1 %v1214_v5  ;;  %v1262_v5 = vsel %vm1123_vm3, %v3920_v56, -inf  ;;  %v3926_v11 = vpop.f32.mrf.mxu1 }
 0x231   :  { %4693 = vst [vmem:[#allocation21_spill] sm:$0xff] %v3926_v11 }
 0x234   :  { %1209 = vmax.xlane.f32.xlu1 %v1208_v17  ;;  %1194 = vmax.xlane.f32.xlu0 %v1193_v22  ;;  %v1253_v17 = vsel %vm1123_vm3, %v3908_v43, -inf  ;;  %v3930_v22 = vpop.f32.mrf.mxu0 }
 0x238   :  { %1188 = vmax.xlane.f32.xlu0 %v1187_v31  ;;  %1227 = vmax.xlane.f32.xlu1 %v1226_v26  ;;  %v1256_v26 = vsel %vm1123_vm3, %v3926_v11, -inf  ;;  %v1241_v31 = vsel %vm1123_vm3, %v3930_v22, -inf }
 0x23c   :  { %1218 = vmax.xlane.f32.xlu0 %v1217_v41  ;;  %1251 = vmax.xlane.f32.xlu1 %v1250_v36  ;;  %v3936_v36 = vpop.f32.mrf.mxu0 }
 0x23d   :  { %4694 = vst [vmem:[#allocation22_spill] sm:$0xff] %v3936_v36  ;;  %v1235_v41 = vsel %vm1123_vm3, %v3936_v36, -inf }
 0x240   :  { %1212 = vmax.xlane.f32.xlu0 %v1211_v49  ;;  %1239 = vmax.xlane.f32.xlu1 %v1238_v46  ;;  %v3944_v46 = vpop.f32.mrf.mxu1 }
 0x241   :  { %4695 = vst [vmem:[#allocation23_spill] sm:$0xff] %v3944_v46  ;;  %v1265_v49 = vsel %vm1123_vm3, %v3944_v46, -inf }
 0x244   :  { %1230 = vmax.xlane.f32.xlu0 %v1229_v59  ;;  %1233 = vmax.xlane.f32.xlu1 %v1232_v53  ;;  %v3948_v53 = vpop.f32.mrf.mxu1 }
 0x245   :  { %4696 = vst [vmem:[#allocation24_spill] sm:$0xff] %v3948_v53  ;;  %v1259_v59 = vsel %vm1123_vm3, %v3948_v53, -inf }
 0x248   :  { %1254 = vmax.xlane.f32.xlu0 %v1253_v17  ;;  %1263 = vmax.xlane.f32.xlu1 %v1262_v5  ;;  %v56_v5 = vld [vmem:[%s4652_s2 + $0x50] sm:$0xff]  ;;  %v57_v17 = vld [vmem:[%s4652_s2 + $0x58] sm:$0xff] }
 0x24c   :  { %1257 = vmax.xlane.f32.xlu1 %v1256_v26  ;;  %1242 = vmax.xlane.f32.xlu0 %v1241_v31  ;;  %v3958_v26 = vpop.f32.mrf.mxu0 }
 0x24e   :  { %v3960_v31 = vpop.f32.mrf.mxu0 }
 0x250   :  { %1236 = vmax.xlane.f32.xlu0 %v1235_v41  ;;  %v3962_v41 = vpop.f32.mrf.mxu1 }
 0x252   :  { %v3966_v13 = vpop.f32.mrf.mxu1 }
 0x254   :  { %1266 = vmax.xlane.f32.xlu0 %v1265_v49  ;;  %v3964_v49 = vpop.f32.mrf.mxu0  ;;  %v3970_v2 = vpop.f32.mrf.mxu1 }
 0x256   :  { %v3978_v6 = vpop.f32.mrf.mxu1 }
 0x258   :  { %1260 = vmax.xlane.f32.xlu0 %v1259_v59  ;;  %v3968_v59 = vpop.f32.mrf.mxu0  ;;  %v3986_v11 = vpop.f32.mrf.mxu1 }
 0x259   :  { %4698 = vst [vmem:[#allocation26_spill] sm:$0xff] %v3986_v11 }
 0x25d   :  { %110 = vperm.xlu1 %3275, %v56_v5   ;;  %v1220_v5 = vsel %vm1123_vm3, %v3876_v10, -inf }
 0x26e   :  { %115 = vperm.xlu0 %3274, %v57_v17   ;;  %v3976_v17 = vpop.f32.mrf.mxu0 }
 0x26f   :  { %4697 = vst [vmem:[#allocation25_spill] sm:$0xff] %v3976_v17  ;;  %v1286_v61 = vsel %vm1123_vm3, %v3976_v17, -inf }
 0x270   :  { %v3990_v18 = vpop.f32.mrf.mxu0 }
 0x271   :  { %4699 = vst [vmem:[#allocation27_spill] sm:$0xff] %v3990_v18  ;;  %v1280_v17 = vsel %vm1123_vm3, %v3990_v18, -inf }
 0x281   :  { %1221 = vmax.xlane.f32.xlu1 %v1220_v5  ;;  %v1310_v5 = vsel %vm1123_vm3, %v3986_v11, -inf  ;;  %v1247_v11 = vsel %vm1123_vm3, %v3916_v52, -inf }
 0x285   :  { %v1132_v43 = vpop.xlane.xlu1 %1131  ;;  %1245 = vmax.xlane.f32.xlu1 %v1244_v0 }
 0x286   :  { %v1318_v48 = vsub.f32 %v3760_v4, %v1132_v43 }
 0x288   :  { %v1384_v30 = vmul.f32 1.442695, %v1318_v48 }
 0x289   :  { %v1126_v10 = vpop.xlane.xlu1 %1125  ;;  %1287 = vmax.xlane.f32.xlu1 %v1286_v61  ;;  %v1135_v53 = vpop.xlane.xlu0 %1134 }
 0x28a   :  { %v3999_v61 = vpop.f32.mrf.mxu1  ;;  %v1316_v39 = vsub.f32 %v3766_v7, %v1126_v10  ;;  %3284 = vpow2.f32 %v1384_v30  ;;  %v1319_v48 = vsub.f32 %v3768_v8, %v1135_v53  ;;  %v1298_v30 = vsel %vm1123_vm3, %v3962_v41, -inf }
 0x28b   :  { %4700 = vst [vmem:[#allocation28_spill] sm:$0xff] %v3999_v61 }
 0x28d   :  { %v1156_v56 = vpop.xlane.xlu1 %1155  ;;  %1224 = vmax.xlane.f32.xlu0 %v1223_v35  ;;  %1311 = vmax.xlane.f32.xlu1 %v1310_v5  ;;  %v3994_v0 = vpop.xlane.xlu0 %1128  ;;  %v1304_v35 = vsel %vm1123_vm3, %v3999_v61, -inf  ;;  %v1380_v61 = vmul.f32 1.442695, %v1316_v39  ;;  %v1386_v39 = vmul.f32 1.442695, %v1319_v48 }
 0x28e   :  { %v4005_v5 = vpop.f32.mrf.mxu0 }
 0x28f   :  { %v1289_v4 = vsel %vm1123_vm3, %v4005_v5, -inf  ;;  %3286 = vpow2.f32 %v1380_v61  ;;  %v1317_v61 = vsub.f32 %v3776_v12, %v3994_v0  ;;  %v1277_v12 = vsel %vm1123_vm3, %v3964_v49, -inf }
 0x290   :  { %v4016_v27 = vpop.f32.mrf.mxu0 }
 0x291   :  { %v1150_v46 = vpop.xlane.xlu1 %1149  ;;  %1248 = vmax.xlane.f32.xlu0 %v1247_v11  ;;  %1281 = vmax.xlane.f32.xlu1 %v1280_v17  ;;  %v1144_v36 = vpop.xlane.xlu0 %1143  ;;  %v1274_v17 = vsel %vm1123_vm3, %v3958_v26, -inf  ;;  %v1283_v8 = vsel %vm1123_vm3, %v4016_v27, -inf  ;;  %v1382_v0 = vmul.f32 1.442695, %v1317_v61 }
 0x292   :  { %v1322_v43 = vsub.f32 %v3784_v16, %v1144_v36  ;;  %v4011_v11 = vpop.f32.mrf.mxu1  ;;  %v1324_v53 = vsub.f32 %v3780_v14, %v1150_v46 }
 0x293   :  { %4701 = vst [vmem:[#allocation29_spill] sm:$0xff] %v4011_v11  ;;  %v1313_v7 = vsel %vm1123_vm3, %v4011_v11, -inf }
 0x294   :  { %v1392_v10 = vmul.f32 1.442695, %v1322_v43  ;;  %v4027_v11 = vpop.f32.mrf.mxu1  ;;  %v1396_v14 = vmul.f32 1.442695, %v1324_v53 }
 0x295   :  { %v1138_v18 = vpop.xlane.xlu1 %1137  ;;  %1305 = vmax.xlane.f32.xlu1 %v1304_v35  ;;  %1290 = vmax.xlane.f32.xlu0 %v1289_v4  ;;  %v1159_v52 = vpop.xlane.xlu0 %1158  ;;  %v1326_v4 = vsub.f32 %v3770_v9, %v1156_v56  ;;  %v1307_v46 = vsel %vm1123_vm3, %v4027_v11, -inf }
 0x296   :  { %3288 = vpow2.f32 %v1392_v10  ;;  %v1320_v9 = vsub.f32 %v3792_v20, %v1138_v18 }
 0x297   :  { %v1400_v56 = vmul.f32 1.442695, %v1326_v4  ;;  %v1327_v4 = vsub.f32 %v3790_v19, %v1159_v52 }
 0x299   :  { %v1147_v16 = vpop.xlane.xlu1 %1146  ;;  %1275 = vmax.xlane.f32.xlu1 %v1274_v17  ;;  %1314 = vmax.xlane.f32.xlu0 %v1313_v7  ;;  %v1153_v36 = vpop.xlane.xlu0 %1152  ;;  %v1268_v7 = vsel %vm1123_vm3, %v3960_v31, -inf }
 0x29a   :  { %v1323_v35 = vsub.f32 %v3800_v24, %v1147_v16  ;;  %v1388_v16 = vmul.f32 1.442695, %v1320_v9  ;;  %v1402_v9 = vmul.f32 1.442695, %v1327_v4 }
 0x29c   :  { %v1394_v43 = vmul.f32 1.442695, %v1323_v35  ;;  %v1292_v35 = vsel %vm1123_vm3, %v3966_v13, -inf }
 0x29d   :  { %v1162_v17 = vpop.xlane.xlu1 %1161  ;;  %1299 = vmax.xlane.f32.xlu1 %v1298_v30  ;;  %1284 = vmax.xlane.f32.xlu0 %v1283_v8  ;;  %v1168_v24 = vpop.xlane.xlu0 %1167 }
 0x29e   :  { %3290 = vpow2.f32 %v1394_v43  ;;  %v1330_v20 = vsub.f32 %v3802_v25, %v1168_v24  ;;  %v4043_v8 = vpop.eup %3284  ;;  %v1301_v24 = vsel %vm1123_vm3, %v3970_v2, -inf }
 0x29f   :  { %3292 = vpow2.f32 %v1386_v39  ;;  %v1514_v52 = vsel %vm1123_vm3, %v4043_v8, 0.0 }
 0x2a0   :  { %3294 = vpow2.f32 %v1400_v56  ;;  %v1408_v53 = vmul.f32 1.442695, %v1330_v20  ;;  %v4051_v56 = vpop.eup %3286 }
 0x2a1   :  { %v1180_v48 = vpop.xlane.xlu1 %1179  ;;  %1269 = vmax.xlane.f32.xlu1 %v1268_v7  ;;  %1308 = vmax.xlane.f32.xlu0 %v1307_v46  ;;  %v1141_v10 = vpop.xlane.xlu0 %1140  ;;  %3296 = vpow2.f32 %v1396_v14  ;;  %v1328_v7 = vsub.f32 %v3810_v29, %v1162_v17  ;;  %v1508_v17 = vsel %vm1123_vm3, %v4051_v56, 0.0 }
 0x2a2   :  { %v1321_v18 = vsub.f32 %v3808_v28, %v1141_v10  ;;  %3298 = vpow2.f32 %v1388_v16  ;;  %v1325_v28 = vsub.f32 %v3794_v21, %v1153_v36  ;;  %v1334_v10 = vsub.f32 %v3816_v32, %v1180_v48 }
 0x2a3   :  { %v1271_v16 = vsel %vm1123_vm3, %v3968_v59, -inf }
 0x2a4   :  { %v1390_v30 = vmul.f32 1.442695, %v1321_v18  ;;  %v1398_v36 = vmul.f32 1.442695, %v1325_v28  ;;  %v1416_v48 = vmul.f32 1.442695, %v1334_v10 }
 0x2a5   :  { %v1174_v39 = vpop.xlane.xlu1 %1173  ;;  %1293 = vmax.xlane.f32.xlu1 %v1292_v35  ;;  %1278 = vmax.xlane.f32.xlu0 %v1277_v12  ;;  %v1171_v25 = vpop.xlane.xlu0 %1170  ;;  %v1404_v35 = vmul.f32 1.442695, %v1328_v7  ;;  %v4702_v28 = vmov 0.0  }
 0x2a6   :  { %v1331_v43 = vsub.f32 %v3818_v33, %v1171_v25  ;;  %3300 = vpow2.f32 %v1390_v30  ;;  %v3289_v33 = vpop.eup %3288  ;;  %v1332_v4 = vsub.f32 %v3820_v34, %v1174_v39  ;;  %v1295_v30 = vsel %vm1123_vm3, %v3978_v6, -inf }
 0x2a7   :  { %3302 = vpow2.f32 %v1382_v0 }
 0x2a8   :  { %v1410_v19 = vmul.f32 1.442695, %v1331_v43  ;;  %3304 = vpow2.f32 %v1408_v53 }
 0x2a9   :  { %v4054_v61 = vpop.xlane.xlu1 %1203  ;;  %1515 = vadd.xlane.f32.xlu1 %v1514_v52  ;;  %1302 = vmax.xlane.f32.xlu0 %v1301_v24  ;;  %v1165_v21 = vpop.xlane.xlu0 %1164  ;;  %v1412_v52 = vmul.f32 1.442695, %v1332_v4 }
 0x2aa   :  { %v1329_v14 = vsub.f32 %v3826_v37, %v1165_v21  ;;  %3306 = vpow2.f32 %v1410_v19 }
 0x2ab   :  { %v4057_v46 = vpop.eup %3290  ;;  %3308 = vpow2.f32 %v1402_v9 }
 0x2ac   :  { %v1406_v29 = vmul.f32 1.442695, %v1329_v14  ;;  %v1703_v20 = vpack.c.bf16 %v4057_v46, %v3289_v33  ;;  %v4065_v18 = vpop.eup %3292  ;;  %3310 = vpow2.f32 %v1398_v36 }
 0x2ad   :  { %v1198_v12 = vpop.xlane.xlu1 %1197  ;;  %1509 = vadd.xlane.f32.xlu1 %v1508_v17  ;;  %1272 = vmax.xlane.f32.xlu0 %v1271_v16  ;;  %v1183_v37 = vpop.xlane.xlu0 %1182  ;;  %v1517_v25 = vsel %vm1123_vm3, %v4065_v18, 0.0  ;;  %v1342_v16 = vsub.f32 %v3832_v40, %v4054_v61 }
 0x2ae   :  { %v1745_v32 = vsel %vm1123_vm3, %v1703_v20, 0  ;;  %3312 = vpow2.f32 %v1406_v29  ;;  %v4068_v0 = vpop.eup %3294  ;;  %v1335_v34 = vsub.f32 %v3828_v38, %v1183_v37  ;;  %v1340_v38 = vsub.f32 %v3840_v44, %v1198_v12 }
 0x2af   :  { %3149 = vmatpush3.bf16.xpose.msra.mxu0 %v1745_v32  ;;  %v4076_v53 = vpop.eup %3296  ;;  %3314 = vpow2.f32 %v1404_v35  ;;  %v1538_v39 = vsel %vm1123_vm3, %v4068_v0, 0.0  ;;  %v1526_v32 = vsel %vm1123_vm3, %v3289_v33, 0.0  ;;  %v1432_v61 = vmul.f32 1.442695, %v1342_v16 }
 0x2b0   :  { %3150 = vmatprep.subr.bf16.mxu0 %v4702_v28  ;;  %v3299_v9 = vpop.eup %3298  ;;  %3316 = vpow2.f32 %v1416_v48  ;;  %v1532_v7 = vsel %vm1123_vm3, %v4076_v53, 0.0  ;;  %v1418_v35 = vmul.f32 1.442695, %v1335_v34  ;;  %v1701_v33 = vpack.c.bf16 %v4065_v18, %v4043_v8 }
 0x2b1   :  { %v1192_v43 = vpop.xlane.xlu1 %1191  ;;  %1296 = vmax.xlane.f32.xlu0 %v1295_v30  ;;  %1518 = vadd.xlane.f32.xlu1 %v1517_v25  ;;  %v1177_v24 = vpop.xlane.xlu0 %1176  ;;  %3318 = vpow2.f32 %v1412_v52  ;;  %v1428_v25 = vmul.f32 1.442695, %v1340_v38 }
 0x2b2   :  { %v1338_v12 = vsub.f32 %v3842_v45, %v1192_v43  ;;  %3320 = vpow2.f32 %v1418_v35 }
 0x2b3   :  { %v3301_v19 = vpop.eup %3300  ;;  %3322 = vpow2.f32 %v1432_v61 }
 0x2b4   :  { %v4083_v21 = vpop.eup %3302  ;;  %v1702_v10 = vpack.c.bf16 %v3301_v19, %v3299_v9  ;;  %v1424_v16 = vmul.f32 1.442695, %v1338_v12  ;;  %3324 = vpow2.f32 %v1428_v25 }
 0x2b5   :  { %v1186_v36 = vpop.xlane.xlu1 %1185  ;;  %1539 = vadd.xlane.f32.xlu0 %v1538_v39  ;;  %1533 = vadd.xlane.f32.xlu1 %v1532_v7  ;;  %v4085_v14 = vpop.xlane.xlu0 %1206  ;;  %v1511_v37 = vsel %vm1123_vm3, %v4083_v21, 0.0  ;;  %v1333_v39 = vsub.f32 %v3836_v42, %v1177_v24  ;;  %v1520_v7 = vsel %vm1123_vm3, %v3299_v9, 0.0  ;;  %v1739_v42 = vsel %vm1123_vm3, %v1701_v33, 0 }
 0x2b6   :  { %v3305_v29 = vpop.eup %3304  ;;  %v1742_v17 = vsel %vm1123_vm3, %v1702_v10, 0  ;;  %v1336_v38 = vsub.f32 %v3846_v47, %v1186_v36  ;;  %v1343_v35 = vsub.f32 %v3852_v50, %v4085_v14  ;;  %3326 = vpow2.f32 %v1424_v16 }
 0x2b7   :  { %v4091_v20 = vpop.eup %3306  ;;  %3151 = vmatpush3.bf16.xpose.msra.mxu0 %v1742_v17  ;;  %v1414_v17 = vmul.f32 1.442695, %v1333_v39  ;;  %v1550_v14 = vsel %vm1123_vm3, %v3305_v29, 0.0 }
 0x2b8   :  { %v4096_v48 = vpop.eup %3308  ;;  %v1707_v44 = vpack.c.bf16 %v4091_v20, %v3305_v29  ;;  %3152 = vmatprep.subr.bf16.mxu0 %v4702_v28  ;;  %v1434_v25 = vmul.f32 1.442695, %v1343_v35 }
 0x2b9   :  { %1512 = vadd.xlane.f32.xlu0 %v1511_v37  ;;  %1527 = vadd.xlane.f32.xlu1 %v1526_v32  ;;  %v4098_v40 = vpop.xlane.xlu0 %1200  ;;  %v1216_v4 = vpop.xlane.xlu1 %1215  ;;  %v1541_v45 = vsel %vm1123_vm3, %v4096_v48, 0.0  ;;  %v1700_v32 = vpack.c.bf16 %v4083_v21, %v4051_v56 }
 0x2ba   :  { %v4103_v30 = vpop.eup %3310  ;;  %v1800_v52 = vsel %vm1123_vm3, %v1707_v44, 0  ;;  %v1420_v44 = vmul.f32 1.442695, %v1336_v38  ;;  %v1346_v61 = vsub.f32 %v3866_v57, %v1216_v4  ;;  %v1341_v56 = vsub.f32 %v3860_v54, %v4098_v40 }
 0x2bb   :  { %v4108_v34 = vpop.eup %3312  ;;  %3161 = vmatpush3.bf16.xpose.msra.mxu1 %v1800_v52  ;;  %v1535_v18 = vsel %vm1123_vm3, %v4103_v30, 0.0  ;;  %v1736_v33 = vsel %vm1123_vm3, %v1700_v32, 0  ;;  %v1705_v54 = vpack.c.bf16 %v4096_v48, %v4068_v0 }
 0x2bc   :  { %v3315_v10 = vpop.eup %3314  ;;  %3162 = vmatprep.subr.bf16.mxu1 %v4702_v28  ;;  %v1440_v4 = vmul.f32 1.442695, %v1346_v61  ;;  %v1430_v40 = vmul.f32 1.442695, %v1341_v56 }
 0x2bd   :  { %1521 = vadd.xlane.f32.xlu1 %v1520_v7  ;;  %1542 = vadd.xlane.f32.xlu0 %v1541_v45  ;;  %v1195_v43 = vpop.xlane.xlu0 %1194  ;;  %v1706_v24 = vpack.c.bf16 %v4108_v34, %v3315_v10  ;;  %v4121_v9 = vpop.eup %3316  ;;  %v1544_v39 = vsel %vm1123_vm3, %v3315_v10, 0.0  ;;  %v1794_v38 = vsel %vm1123_vm3, %v1705_v54, 0 }
 0x2be   :  { %v1339_v8 = vsub.f32 %v3854_v51, %v1195_v43  ;;  %v1210_v37 = vpop.xlane.xlu1 %1209  ;;  %v1523_v51 = vsel %vm1123_vm3, %v3301_v19, 0.0  ;;  %v1562_v19 = vsel %vm1123_vm3, %v4121_v9, 0.0  ;;  %v4137_v57 = vpop.eup %3318 }
 0x2bf   :  { %3153 = vmatpush3.bf16.xpose.msra.mxu0 %v1739_v42  ;;  %v1797_v50 = vsel %vm1123_vm3, %v1706_v24, 0  ;;  %v1556_v45 = vsel %vm1123_vm3, %v4137_v57, 0.0  ;;  %v4147_v43 = vpop.eup %3320  ;;  %v1344_v16 = vsub.f32 %v3872_v60, %v1210_v37 }
 0x2c0   :  { %v1426_v47 = vmul.f32 1.442695, %v1339_v8  ;;  %3154 = vmatprep.subr.bf16.mxu0 %v4702_v28  ;;  %v4154_v48 = vpop.eup %3322  ;;  %v1547_v8 = vsel %vm1123_vm3, %v4108_v34, 0.0 }
 0x2c1   :  { %1536 = vadd.xlane.f32.xlu0 %v1535_v18  ;;  %1524 = vadd.xlane.f32.xlu1 %v1523_v51  ;;  %v1189_v36 = vpop.xlane.xlu0 %1188  ;;  %v4159_v42 = vpop.eup %3324  ;;  %v1586_v51 = vsel %vm1123_vm3, %v4154_v48, 0.0 }
 0x2c2   :  { %v1337_v12 = vsub.f32 %v3862_v55, %v1189_v36  ;;  %3328 = vpow2.f32 %v1426_v47  ;;  %v1228_v52 = vpop.xlane.xlu1 %1227  ;;  %v1580_v36 = vsel %vm1123_vm3, %v4159_v42, 0.0 }
 0x2c3   :  { %3330 = vpow2.f32 %v1414_v17  ;;  %3163 = vmatpush3.bf16.xpose.msra.mxu1 %v1797_v50  ;;  %v1436_v17 = vmul.f32 1.442695, %v1344_v16  ;;  %v3327_v34 = vpop.eup %3326  ;;  %v4704_v16 = vld [vmem:[#allocation16_spill] sm:$0xff] }
 0x2c4   :  { %v1422_v21 = vmul.f32 1.442695, %v1337_v12  ;;  %3332 = vpow2.f32 %v1420_v44  ;;  %3164 = vmatprep.subr.bf16.mxu1 %v4702_v28 }
 0x2c5   :  { %1551 = vadd.xlane.f32.xlu0 %v1550_v14  ;;  %1563 = vadd.xlane.f32.xlu1 %v1562_v19  ;;  %v1219_v55 = vpop.xlane.xlu0 %1218  ;;  %v1574_v19 = vsel %vm1123_vm3, %v3327_v34, 0.0 }
 0x2c6   :  { %v1347_v29 = vsub.f32 %v3882_v15, %v1219_v55  ;;  %3334 = vpow2.f32 %v1422_v21  ;;  %v234_v15 = vadd.f32 %v3750_v63, %v3974_v62  ;;  %v1350_v63 = vsub.f32 %v3868_v58, %v1228_v52  ;;  %v1252_v60 = vpop.xlane.xlu1 %1251 }
 0x2c7   :  { %3336 = vpow2.f32 %v1434_v25  ;;  %3155 = vmatpush3.bf16.xpose.msra.mxu0 %v1736_v33  ;;  %v1704_v58 = vpack.c.bf16 %v4103_v30, %v4076_v53  ;;  %v237_v21 = vadd.f32 %v3758_v3, %v3982_v1 }
 0x2c8   :  { %v1442_v7 = vmul.f32 1.442695, %v1347_v29  ;;  %3338 = vpow2.f32 %v1440_v4  ;;  %3172 = vmatprep.subr.bf16.mxu0 %v4702_v28  ;;  %v345_v24 = vpack.c.bf16 %v234_v15, %v234_v15  ;;  %v1448_v47 = vmul.f32 1.442695, %v1350_v63 }
 0x2c9   :  { %1545 = vadd.xlane.f32.xlu0 %v1544_v39  ;;  %1557 = vadd.xlane.f32.xlu1 %v1556_v45  ;;  %v1213_v10 = vpop.xlane.xlu0 %1212  ;;  %v1791_v12 = vsel %vm1123_vm3, %v1704_v58, 0  ;;  %v4703_v39 = vld [vmem:[#allocation13_spill] sm:$0xff]  ;;  %v346_v15 = vpack.c.bf16 %v237_v21, %v237_v21 }
 0x2ca   :  { %v1345_v0 = vsub.f32 %v3890_v23, %v1213_v10  ;;  %3340 = vpow2.f32 %v1442_v7  ;;  %v1565_v23 = vsel %vm1123_vm3, %v4147_v43, 0.0  ;;  %v1240_v53 = vpop.xlane.xlu1 %1239  ;;  %v1358_v54 = vsub.f32 %v4703_v39, %v1252_v60 }
 0x2cb   :  { %3342 = vpow2.f32 %v1430_v40  ;;  %3165 = vmatpush3.bf16.xpose.msra.mxu1 %v1794_v38  ;;  %v1354_v10 = vsub.f32 %v4704_v16, %v1240_v53 }
 0x2cc   :  { %v1438_v18 = vmul.f32 1.442695, %v1345_v0  ;;  %3166 = vmatprep.subr.bf16.mxu1 %v4702_v28 }
 0x2cd   :  { %1548 = vadd.xlane.f32.xlu0 %v1547_v8  ;;  %1566 = vadd.xlane.f32.xlu1 %v1565_v23  ;;  %v4164_v35 = vpop.xlane.xlu0 %1230 }
 0x2ce   :  { %3344 = vpow2.f32 %v1438_v18  ;;  %3157 = vmatmul.mubr.msk.bf16.vlgmr.msra.gmra.mxu0 %vm1123_vm3, %v345_v24  ;;  %v1234_v40 = vpop.xlane.xlu1 %1233  ;;  %v1464_v18 = vmul.f32 1.442695, %v1358_v54 }
 0x2cf   :  { %v3329_v37 = vpop.eup %3328  ;;  %3180 = vmatprep.mubr.msk.bf16.mxu0 %vm3564_vm4, %v4702_v28  ;;  %3346 = vpow2.f32 %v1436_v17  ;;  %v1456_v17 = vmul.f32 1.442695, %v1354_v10  ;;  %v4710_v10 = vld [vmem:[#allocation24_spill] sm:$0xff] }
 0x2d0   :  { %v4176_v32 = vpop.eup %3330  ;;  %v1711_v61 = vpack.c.bf16 %v3329_v37, %v3327_v34  ;;  %3348 = vpow2.f32 %v1448_v47  ;;  %v1577_v24 = vsel %vm1123_vm3, %v3329_v37, 0.0 }
 0x2d1   :  { %1587 = vadd.xlane.f32.xlu0 %v1586_v51  ;;  %1581 = vadd.xlane.f32.xlu1 %v1580_v36  ;;  %v4178_v44 = vpop.xlane.xlu0 %1254  ;;  %v3333_v30 = vpop.eup %3332  ;;  %v1559_v25 = vsel %vm1123_vm3, %v4176_v32, 0.0  ;;  %v4705_v51 = vld [vmem:[#allocation22_spill] sm:$0xff] }
 0x2d2   :  { %v1855_v50 = vsel %vm1123_vm3, %v1711_v61, 0  ;;  %v1568_v7 = vsel %vm1123_vm3, %v3333_v30, 0.0  ;;  %v1264_v47 = vpop.xlane.xlu1 %1263  ;;  %v4706_v61 = vld [vmem:[#allocation23_spill] sm:$0xff] }
 0x2d3   :  { %v3335_v14 = vpop.eup %3334  ;;  %3167 = vmatpush3.bf16.xpose.msra.mxu1 %v1791_v12  ;;  %3173 = vmatpush3.bf16.xpose.msra.mxu0 %v1855_v50  ;;  %v4707_v12 = vld [vmem:[#allocation18_spill] sm:$0xff] }
 0x2d4   :  { %v4185_v56 = vpop.eup %3336  ;;  %3174 = vmatprep.subr.bf16.mxu0 %v4702_v28  ;;  %3184 = vmatprep.subr.bf16.mxu1 %v4702_v28  ;;  %v1710_v29 = vpack.c.bf16 %v3335_v14, %v3333_v30  ;;  %v1709_v30 = vpack.c.bf16 %v4147_v43, %v4121_v9  ;;  %v1352_v50 = vsub.f32 %v4707_v12, %v1234_v40 }
 0x2d5   :  { %1575 = vadd.xlane.f32.xlu1 %v1574_v19  ;;  %1560 = vadd.xlane.f32.xlu0 %v1559_v25  ;;  %v1243_v55 = vpop.xlane.xlu0 %1242  ;;  %v3339_v4 = vpop.eup %3338  ;;  %v1589_v3 = vsel %vm1123_vm3, %v4185_v56, 0.0  ;;  %v1571_v25 = vsel %vm1123_vm3, %v3335_v14, 0.0 }
 0x2d6   :  { %v1355_v52 = vsub.f32 %v3930_v22, %v1243_v55  ;;  %v1852_v8 = vsel %vm1123_vm3, %v1710_v29, 0  ;;  %v1598_v19 = vsel %vm1123_vm3, %v3339_v4, 0.0  ;;  %v4708_v55 = vld [vmem:[#allocation20_spill] sm:$0xff]  ;;  %v1849_v29 = vsel %vm1123_vm3, %v1709_v30, 0 }
 0x2d7   :  { %v4192_v33 = vpop.eup %3340  ;;  %v1452_v54 = vmul.f32 1.442695, %v1352_v50 }
 0x2d8   :  { %v4198_v45 = vpop.eup %3342  ;;  %v1715_v22 = vpack.c.bf16 %v4192_v33, %v3339_v4  ;;  %v1458_v38 = vmul.f32 1.442695, %v1355_v52  ;;  %v1362_v52 = vsub.f32 %v4708_v55, %v1264_v47 }
 0x2d9   :  { %1569 = vadd.xlane.f32.xlu1 %v1568_v7  ;;  %1590 = vadd.xlane.f32.xlu0 %v1589_v3  ;;  %v1237_v0 = vpop.xlane.xlu0 %1236  ;;  %v1583_v23 = vsel %vm1123_vm3, %v4198_v45, 0.0  ;;  %v1258_v7 = vpop.xlane.xlu1 %1257 }
 0x2da   :  { %3169 = vmatmul.mubr.msk.bf16.vlgmr.msra.gmra.mxu1 %vm1123_vm3, %v346_v15  ;;  %v1910_v63 = vsel %vm1123_vm3, %v1715_v22, 0  ;;  %v1353_v36 = vsub.f32 %v4705_v51, %v1237_v0  ;;  %3350 = vpow2.f32 %v1458_v38  ;;  %v1472_v3 = vmul.f32 1.442695, %v1362_v52  ;;  %v4709_v15 = vld [vmem:[#allocation12_spill] sm:$0xff]  ;;  %v4713_v51 = vld [vmem:[#allocation17_spill] sm:$0xff] }
 0x2db   :  { %v4205_v60 = vpop.eup %3344  ;;  %3175 = vmatpush3.bf16.xpose.msra.mxu0 %v1852_v8  ;;  %3185 = vmatpush3.bf16.xpose.msra.mxu1 %v1910_v63  ;;  %3352 = vpow2.f32 %v1464_v18  ;;  %v1351_v16 = vsub.f32 %v4709_v15, %v4164_v35  ;;  %v1708_v22 = vpack.c.bf16 %v4176_v32, %v4137_v57  ;;  %v1713_v38 = vpack.c.bf16 %v4185_v56, %v4154_v48  ;;  %v4711_v35 = vld [vmem:[#allocation21_spill] sm:$0xff] }
 0x2dc   :  { %v3347_v58 = vpop.eup %3346  ;;  %3176 = vmatprep.subr.bf16.mxu0 %v4702_v28  ;;  %3186 = vmatprep.subr.bf16.mxu1 %v4702_v28  ;;  %3354 = vpow2.f32 %v1456_v17  ;;  %v1454_v9 = vmul.f32 1.442695, %v1353_v36  ;;  %v1601_v8 = vsel %vm1123_vm3, %v4192_v33, 0.0  ;;  %v1360_v63 = vsub.f32 %v4711_v35, %v1258_v7  ;;  %v4712_v33 = vld [vmem:[#allocation5_spill] sm:$0xff] }
 0x2dd   :  { %1584 = vadd.xlane.f32.xlu0 %v1583_v23  ;;  %1578 = vadd.xlane.f32.xlu1 %v1577_v24  ;;  %v1267_v34 = vpop.xlane.xlu0 %1266  ;;  %v1714_v37 = vpack.c.bf16 %v4205_v60, %v3347_v58  ;;  %v4222_v21 = vpop.eup %3348  ;;  %v1592_v14 = vsel %vm1123_vm3, %v3347_v58, 0.0  ;;  %v1450_v18 = vmul.f32 1.442695, %v1351_v16  ;;  %v1846_v17 = vsel %vm1123_vm3, %v1708_v22, 0 }
 0x2de   :  { %v1363_v53 = vsub.f32 %v4706_v61, %v1267_v34  ;;  %3192 = vmatprep.mubr.msk.bf16.mxu1 %vm3564_vm4, %v4702_v28  ;;  %v1610_v4 = vsel %vm1123_vm3, %v4222_v21, 0.0  ;;  %3356 = vpow2.f32 %v1454_v9  ;;  %v4242_v23 = vpop.permute.xlu1 %110  ;;  %v1904_v34 = vsel %vm1123_vm3, %v1713_v38, 0  ;;  %v4715_v38 = vld [vmem:[#allocation11_spill] sm:$0xff] }
 0x2df   :  { %v1907_v39 = vsel %vm1123_vm3, %v1714_v37, 0  ;;  %v1595_v48 = vsel %vm1123_vm3, %v4205_v60, 0.0  ;;  %v1468_v56 = vmul.f32 1.442695, %v1360_v63  ;;  %v242_v58 = vadd.f32 %v4712_v33, %v4242_v23  ;;  %v4717_v33 = vld [vmem:[#allocation14_spill] sm:$0xff] }
 0x2e0   :  { %v1474_v43 = vmul.f32 1.442695, %v1363_v53  ;;  %v1359_v36 = vsub.f32 %v4713_v51, %v4178_v44  ;;  %v1712_v60 = vpack.c.bf16 %v4198_v45, %v4159_v42 }
 0x2e1   :  { %1599 = vadd.xlane.f32.xlu0 %v1598_v19  ;;  %1572 = vadd.xlane.f32.xlu1 %v1571_v25  ;;  %v1261_v40 = vpop.xlane.xlu0 %1260  ;;  %v347_v30 = vpack.c.bf16 %v242_v58, %v242_v58  ;;  %v4714_v25 = vld [vmem:[#allocation8_spill] sm:$0xff] }
 0x2e2   :  { %3358 = vpow2.f32 %v1474_v43  ;;  %v1361_v0 = vsub.f32 %v4710_v10, %v1261_v40  ;;  %v1466_v50 = vmul.f32 1.442695, %v1359_v36  ;;  %v1901_v44 = vsel %vm1123_vm3, %v1712_v60, 0  ;;  %v4718_v60 = vld [vmem:[#allocation25_spill] sm:$0xff] }
 0x2e3   :  { %3177 = vmatpush3.bf16.xpose.msra.mxu0 %v1849_v29  ;;  %3187 = vmatpush3.bf16.xpose.msra.mxu1 %v1907_v39  ;;  %3360 = vpow2.f32 %v1452_v54 }
 0x2e4   :  { %3178 = vmatprep.subr.bf16.mxu0 %v4702_v28  ;;  %3188 = vmatprep.subr.bf16.mxu1 %v4702_v28  ;;  %3362 = vpow2.f32 %v1472_v3  ;;  %v1470_v24 = vmul.f32 1.442695, %v1361_v0 }
 0x2e5   :  { %1593 = vadd.xlane.f32.xlu0 %v1592_v14  ;;  %1611 = vadd.xlane.f32.xlu1 %v1610_v4  ;;  %3364 = vpow2.f32 %v1450_v18  ;;  %v4716_v18 = vld [vmem:[#allocation15_spill] sm:$0xff] }
 0x2e6   :  { %3366 = vpow2.f32 %v1470_v24 }
 0x2e7   :  { %v4246_v57 = vpop.eup %3350  ;;  %3368 = vpow2.f32 %v1468_v56 }
 0x2e8   :  { %v3353_v32 = vpop.eup %3352  ;;  %3370 = vpow2.f32 %v1466_v50 }
 0x2e9   :  { %1602 = vadd.xlane.f32.xlu0 %v1601_v8  ;;  %v4253_v47 = vpop.eup %3354  ;;  %v1634_v53 = vsel %vm1123_vm3, %v3353_v32, 0.0  ;;  %v4263_v37 = vpop.permute.xlu0 %115 }
 0x2ea   :  { %v1719_v61 = vpack.c.bf16 %v4246_v57, %v4253_v47  ;;  %v245_v55 = vadd.f32 %v4714_v25, %v4263_v37  ;;  %v4720_v25 = vld [vmem:[#allocation26_spill] sm:$0xff] }
 0x2eb   :  { %3179 = vmatpush3.bf16.xpose.msra.mxu0 %v1846_v17  ;;  %3189 = vmatpush3.bf16.xpose.msra.mxu1 %v1904_v34  ;;  %v4265_v12 = vpop.eup %3356 }
 0x2ec   :  { %3190 = vmatprep.subr.bf16.mxu1 %v4702_v28  ;;  %3196 = vmatprep.subr.bf16.mxu0 %v4702_v28  ;;  %v1965_v19 = vsel %vm1123_vm3, %v1719_v61, 0  ;;  %v348_v29 = vpack.c.bf16 %v245_v55, %v245_v55 }
 0x2ed   :  { %1596 = vadd.xlane.f32.xlu0 %v1595_v48 }
 0x2ef   :  { %v4270_v42 = vpop.eup %3358 }
 0x2f0   :  { %v4272_v45 = vpop.eup %3360 }
 0x2f1   :  { %1635 = vadd.xlane.f32.xlu0 %v1634_v53  ;;  %v4278_v52 = vpop.eup %3362  ;;  %v1718_v9 = vpack.c.bf16 %v4265_v12, %v4272_v45  ;;  %v4719_v53 = vld [vmem:[#allocation19_spill] sm:$0xff] }
 0x2f2   :  { %3181 = vmatmul.mubr.msk.bf16.vlgmr.msra.gmra.mxu0 %vm1123_vm3, %v347_v30  ;;  %v1723_v43 = vpack.c.bf16 %v4270_v42, %v4278_v52  ;;  %v3365_v39 = vpop.eup %3364 }
 0x2f3   :  { %3191 = vmatpush3.bf16.xpose.msra.mxu1 %v1901_v44  ;;  %3197 = vmatpush3.bf16.xpose.msra.mxu0 %v1965_v19  ;;  %v1962_v54 = vsel %vm1123_vm3, %v1718_v9, 0  ;;  %v4289_v40 = vpop.eup %3366  ;;  %v1717_v4 = vpack.c.bf16 %v3365_v39, %v4222_v21 }
 0x2f4   :  { %3198 = vmatprep.subr.bf16.mxu0 %v4702_v28  ;;  %3208 = vmatprep.subr.bf16.mxu1 %v4702_v28  ;;  %v2020_v7 = vsel %vm1123_vm3, %v1723_v43, 0  ;;  %v4293_v14 = vpop.eup %3368 }
 0x2f5   :  { %3204 = vmatprep.mubr.msk.bf16.mxu0 %vm3564_vm4, %v4702_v28  ;;  %v1722_v3 = vpack.c.bf16 %v4289_v40, %v4293_v14  ;;  %v1959_v15 = vsel %vm1123_vm3, %v1717_v4, 0  ;;  %v4302_v10 = vpop.eup %3370  ;;  %v1613_v4 = vsel %vm1123_vm3, %v3365_v39, 0.0 }
 0x2f6   :  { %v1721_v0 = vpack.c.bf16 %v4302_v10, %v3353_v32 }
 0x2f7   :  { %v2017_v16 = vsel %vm1123_vm3, %v1722_v3, 0 }
 0x2f8   :  { %v2014_v8 = vsel %vm1123_vm3, %v1721_v0, 0 }
 0x2fa   :  { %3193 = vmatmul.mubr.msk.bf16.vlgmr.msra.gmra.mxu1 %vm1123_vm3, %v348_v29 }
 0x2fb   :  { %3199 = vmatpush3.bf16.xpose.msra.mxu0 %v1962_v54  ;;  %3209 = vmatpush3.bf16.xpose.msra.mxu1 %v2020_v7 }
 0x2fc   :  { %3200 = vmatprep.subr.bf16.mxu0 %v4702_v28  ;;  %3210 = vmatprep.subr.bf16.mxu1 %v4702_v28 }
 0x2fd   :  { %3216 = vmatprep.mubr.msk.bf16.mxu1 %vm3564_vm4, %v4702_v28 }
 0x303   :  { %3201 = vmatpush3.bf16.xpose.msra.mxu0 %v1959_v15  ;;  %3211 = vmatpush3.bf16.xpose.msra.mxu1 %v2017_v16 }
 0x304   :  { %3212 = vmatprep.subr.bf16.mxu1 %v4702_v28  ;;  %3202 = vmatprep.subr.bf16.mxu0 %v4702_v28 }
 0x30a   :  { %v1222_v22 = vpop.xlane.xlu1 %1221 }
 0x30b   :  { %v1348_v21 = vsub.f32 %v4715_v38, %v1222_v22  ;;  %3213 = vmatpush3.bf16.xpose.msra.mxu1 %v2014_v8  ;;  %v4721_v22 = vld [vmem:[#allocation27_spill] sm:$0xff]  ;;  %v4722_v8 = vld [vmem:[#allocation29_spill] sm:$0xff] }
 0x30c   :  { %3214 = vmatprep.subr.bf16.mxu1 %v4702_v28 }
 0x30d   :  { %v1444_v35 = vmul.f32 1.442695, %v1348_v21 }
 0x30e   :  { %v1246_v63 = vpop.xlane.xlu1 %1245 }
 0x30f   :  { %3372 = vpow2.f32 %v1444_v35  ;;  %v1356_v24 = vsub.f32 %v4716_v18, %v1246_v63 }
 0x311   :  { %v1460_v17 = vmul.f32 1.442695, %v1356_v24  ;;  %v4723_v24 = vld [vmem:[#allocation28_spill] sm:$0xff] }
 0x312   :  { %v1288_v34 = vpop.xlane.xlu1 %1287 }
 0x313   :  { %3374 = vpow2.f32 %v1460_v17  ;;  %v1370_v61 = vsub.f32 %v4718_v60, %v1288_v34 }
 0x315   :  { %v1488_v29 = vmul.f32 1.442695, %v1370_v61 }
 0x316   :  { %v1312_v48 = vpop.xlane.xlu1 %1311  ;;  %v1225_v56 = vpop.xlane.xlu0 %1224 }
 0x317   :  { %v1349_v32 = vsub.f32 %v4717_v33, %v1225_v56  ;;  %v1378_v55 = vsub.f32 %v4720_v25, %v1312_v48 }
 0x319   :  { %v1446_v58 = vmul.f32 1.442695, %v1349_v32  ;;  %v1504_v15 = vmul.f32 1.442695, %v1378_v55  ;;  %v1622_v32 = vsel %vm1123_vm3, %v4253_v47, 0.0  ;;  %v4724_v47 = vld [vmem:[#allocation7_spill] sm:$0xff] }
 0x31a   :  { %v1282_v51 = vpop.xlane.xlu1 %1281  ;;  %v1249_v36 = vpop.xlane.xlu0 %1248  ;;  %v315_v25 = vadd.f32 %v4724_v47, %v3974_v62 }
 0x31b   :  { %v1357_v30 = vsub.f32 %v4719_v53, %v1249_v36  ;;  %3376 = vpow2.f32 %v1446_v58  ;;  %v1368_v38 = vsub.f32 %v4721_v22, %v1282_v51 }
 0x31c   :  { %v3373_v50 = vpop.eup %3372 }
 0x31d   :  { %v1462_v44 = vmul.f32 1.442695, %v1357_v30  ;;  %v1604_v19 = vsel %vm1123_vm3, %v3373_v50, 0.0  ;;  %v1484_v48 = vmul.f32 1.442695, %v1368_v38 }
 0x31e   :  { %v1306_v9 = vpop.xlane.xlu1 %1305  ;;  %1605 = vadd.xlane.f32.xlu1 %v1604_v19  ;;  %v1291_v43 = vpop.xlane.xlu0 %1290 }
 0x31f   :  { %v1371_v54 = vsub.f32 %v4005_v5, %v1291_v43  ;;  %3378 = vpow2.f32 %v1462_v44  ;;  %v1376_v39 = vsub.f32 %v4723_v24, %v1306_v9  ;;  %v1616_v9 = vsel %vm1123_vm3, %v4272_v45, 0.0 }
 0x320   :  { %v3375_v3 = vpop.eup %3374  ;;  %3380 = vpow2.f32 %v1488_v29 }
 0x321   :  { %v1490_v7 = vmul.f32 1.442695, %v1371_v54  ;;  %v1628_v5 = vsel %vm1123_vm3, %v3375_v3, 0.0  ;;  %v1500_v58 = vmul.f32 1.442695, %v1376_v39  ;;  %v1646_v39 = vsel %vm1123_vm3, %v4278_v52, 0.0 }
 0x322   :  { %v1276_v16 = vpop.xlane.xlu1 %1275  ;;  %1614 = vadd.xlane.f32.xlu1 %v1613_v4  ;;  %v1315_v0 = vpop.xlane.xlu0 %1314 }
 0x323   :  { %v1366_v21 = vsub.f32 %v3958_v26, %v1276_v16  ;;  %v1379_v35 = vsub.f32 %v4722_v8, %v1315_v0  ;;  %3382 = vpow2.f32 %v1490_v7  ;;  %v1619_v0 = vsel %vm1123_vm3, %v4265_v12, 0.0 }
 0x324   :  { %3384 = vpow2.f32 %v1504_v15  ;;  %v349_v15 = vpack.c.bf16 %v315_v25, %v315_v25 }
 0x325   :  { %v1480_v63 = vmul.f32 1.442695, %v1366_v21  ;;  %v1506_v18 = vmul.f32 1.442695, %v1379_v35 }
 0x326   :  { %v1300_v17 = vpop.xlane.xlu1 %1299  ;;  %1629 = vadd.xlane.f32.xlu1 %v1628_v5  ;;  %v1285_v34 = vpop.xlane.xlu0 %1284 }
 0x327   :  { %3386 = vpow2.f32 %v1480_v63  ;;  %v1369_v56 = vsub.f32 %v4016_v27, %v1285_v34  ;;  %v1374_v51 = vsub.f32 %v3962_v41, %v1300_v17 }
 0x328   :  { %3388 = vpow2.f32 %v1506_v18  ;;  %v3377_v33 = vpop.eup %3376 }
 0x329   :  { %v1486_v26 = vmul.f32 1.442695, %v1369_v56  ;;  %v1607_v60 = vsel %vm1123_vm3, %v3377_v33, 0.0  ;;  %v1716_v53 = vpack.c.bf16 %v3377_v33, %v3373_v50  ;;  %3390 = vpow2.f32 %v1484_v48 }
 0x32a   :  { %v1270_v36 = vpop.xlane.xlu1 %1269  ;;  %1623 = vadd.xlane.f32.xlu1 %v1622_v32  ;;  %v1309_v61 = vpop.xlane.xlu0 %1308  ;;  %1608 = vadd.xlane.f32.xlu0 %v1607_v60  ;;  %v1496_v50 = vmul.f32 1.442695, %v1374_v51 }
 0x32b   :  { %v1364_v30 = vsub.f32 %v3960_v31, %v1270_v36  ;;  %v1377_v27 = vsub.f32 %v4027_v11, %v1309_v61  ;;  %3392 = vpow2.f32 %v1486_v26  ;;  %v1956_v44 = vsel %vm1123_vm3, %v1716_v53, 0 }
 0x32c   :  { %v3379_v19 = vpop.eup %3378  ;;  %3203 = vmatpush3.bf16.xpose.msra.mxu0 %v1956_v44  ;;  %3394 = vpow2.f32 %v1500_v58  ;;  %v1637_v31 = vsel %vm1123_vm3, %v4302_v10, 0.0  ;;  %v4725_v10 = vld [vmem:[#allocation10_spill] sm:$0xff]  ;;  %v1640_v58 = vsel %vm1123_vm3, %v4293_v14, 0.0 }
 0x32d   :  { %v1476_v41 = vmul.f32 1.442695, %v1364_v30  ;;  %v1502_v55 = vmul.f32 1.442695, %v1377_v27  ;;  %v1720_v29 = vpack.c.bf16 %v3379_v19, %v3375_v3  ;;  %3220 = vmatprep.subr.bf16.mxu0 %v4702_v28  ;;  %v4340_v7 = vpop.eup %3380  ;;  %v318_v16 = vadd.f32 %v4725_v10, %v3982_v1 }
 0x32e   :  { %v1294_v43 = vpop.xlane.xlu1 %1293  ;;  %1617 = vadd.xlane.f32.xlu1 %v1616_v9  ;;  %v1279_v11 = vpop.xlane.xlu0 %1278  ;;  %1638 = vadd.xlane.f32.xlu0 %v1637_v31 }
 0x32f   :  { %3396 = vpow2.f32 %v1476_v41  ;;  %v1372_v62 = vsub.f32 %v3966_v13, %v1294_v43  ;;  %v1367_v54 = vsub.f32 %v3964_v49, %v1279_v11  ;;  %v2011_v45 = vsel %vm1123_vm3, %v1720_v29, 0 }
 0x330   :  { %3398 = vpow2.f32 %v1502_v55  ;;  %v4343_v4 = vpop.eup %3382  ;;  %3215 = vmatpush3.bf16.xpose.msra.mxu1 %v2011_v45  ;;  %v1631_v49 = vsel %vm1123_vm3, %v3379_v19, 0.0  ;;  %v350_v24 = vpack.c.bf16 %v318_v16, %v318_v16  ;;  %v1643_v19 = vsel %vm1123_vm3, %v4289_v40, 0.0 }
 0x331   :  { %v1482_v3 = vmul.f32 1.442695, %v1367_v54  ;;  %3400 = vpow2.f32 %v1496_v50  ;;  %v1492_v13 = vmul.f32 1.442695, %v1372_v62  ;;  %v1727_v21 = vpack.c.bf16 %v4343_v4, %v4340_v7  ;;  %3232 = vmatprep.subr.bf16.mxu1 %v4702_v28  ;;  %v4353_v8 = vpop.eup %3384 }
 0x332   :  { %v1516_v22 = vpop.xlane.xlu1 %1515  ;;  %1620 = vadd.xlane.f32.xlu1 %v1619_v0  ;;  %v1303_v38 = vpop.xlane.xlu0 %1302  ;;  %1632 = vadd.xlane.f32.xlu0 %v1631_v49  ;;  %v2300_v29 = vlaneseq }
 0x333   :  { %v1375_v1 = vsub.f32 %v3970_v2, %v1303_v38  ;;  %3402 = vpow2.f32 %v1482_v3  ;;  %3205 = vmatmul.mubr.msk.bf16.vlgmr.msra.gmra.mxu0 %vm1123_vm3, %v349_v15  ;;  %v2075_v12 = vsel %vm1123_vm3, %v1727_v21, 0 }
 0x334   :  { %v4356_v35 = vpop.eup %3386  ;;  %3221 = vmatpush3.bf16.xpose.msra.mxu0 %v2075_v12  ;;  %3228 = vmatprep.mubr.msk.bf16.mxu0 %vm3564_vm4, %v4702_v28  ;;  %3404 = vpow2.f32 %v1492_v13  ;;  %v4408_v3 = vand.u32 127, %v2300_v29  ;;  %v4417_v12 = vshrl.u32 %v2300_v29, 7 }
 0x335   :  { %v4360_v63 = vpop.eup %3388  ;;  %v1498_v18 = vmul.f32 1.442695, %v1375_v1  ;;  %v1658_v5 = vsel %vm1123_vm3, %v4356_v35, 0.0  ;;  %3222 = vmatprep.subr.bf16.mxu0 %v4702_v28  ;;  %v1670_v1 = vsel %vm1123_vm3, %v4340_v7, 0.0  ;;  %v4726_v7 = vld [vmem:[#allocation6_spill] sm:$0xff] }
 0x336   :  { %v1510_v2 = vpop.xlane.xlu1 %1509  ;;  %1659 = vadd.xlane.f32.xlu1 %v1658_v5  ;;  %v1273_v17 = vpop.xlane.xlu0 %1272  ;;  %v1731_v34 = vpack.c.bf16 %v4360_v63, %v4353_v8  ;;  %1647 = vadd.xlane.f32.xlu0 %v1646_v39  ;;  %v2306_v38 = vadd.s32 4294967288, %v4408_v3  ;;  %v2327_v39 = vadd.s32 4294967264, %v4408_v3 }
 0x337   :  { %3406 = vpow2.f32 %v1498_v18  ;;  %v1365_v48 = vsub.f32 %v3968_v59, %v1273_v17  ;;  %v4372_v56 = vpop.eup %3390  ;;  %3217 = vmatmul.mubr.msk.bf16.vlgmr.msra.gmra.mxu1 %vm1123_vm3, %v350_v24  ;;  %v2313_v18 = vadd.s32 4294967280, %v4408_v3  ;;  %v323_v17 = vadd.f32 %v4726_v7, %v4242_v23 }
 0x338   :  { %v2130_v33 = vsel %vm1123_vm3, %v1731_v34, 0  ;;  %v4376_v26 = vpop.eup %3392  ;;  %3240 = vmatprep.mubr.msk.bf16.mxu1 %vm3564_vm4, %v4702_v28 }
 0x339   :  { %v1478_v32 = vmul.f32 1.442695, %v1365_v48  ;;  %3233 = vmatpush3.bf16.xpose.msra.mxu1 %v2130_v33  ;;  %v1726_v59 = vpack.c.bf16 %v4376_v26, %v4372_v56  ;;  %v4385_v36 = vpop.eup %3394  ;;  %v4428_v33 = vsub.s32 %v4408_v3, %v4417_v12  ;;  %v4436_v23 = vsub.s32 %v2313_v18, %v4417_v12 }
 0x33a   :  { %v1519_v52 = vpop.xlane.xlu1 %1518  ;;  %v1297_v51 = vpop.xlane.xlu0 %1296  ;;  %3234 = vmatprep.subr.bf16.mxu1 %v4702_v28  ;;  %1641 = vadd.xlane.f32.xlu0 %v1640_v58  ;;  %v1529_v18 = vsel %vm1123_vm3, %v4057_v46, 0.0 }
 0x33b   :  { %3408 = vpow2.f32 %v1478_v32  ;;  %v1373_v60 = vsub.f32 %v3978_v6, %v1297_v51  ;;  %v2072_v53 = vsel %vm1123_vm3, %v1726_v59, 0  ;;  %v4431_v32 = vsub.s32 %v2306_v38, %v4417_v12 }
 0x33c   :  { %v4388_v61 = vpop.eup %3396  ;;  %3223 = vmatpush3.bf16.xpose.msra.mxu0 %v2072_v53  ;;  %v4443_v53 = vsub.s32 %v2327_v39, %v4417_v12 }
 0x33d   :  { %v4391_v30 = vpop.eup %3398  ;;  %v1494_v27 = vmul.f32 1.442695, %v1373_v60  ;;  %v1652_v14 = vsel %vm1123_vm3, %v4388_v61, 0.0  ;;  %3224 = vmatprep.subr.bf16.mxu0 %v4702_v28 }
 0x33e   :  { %v1534_v44 = vpop.xlane.xlu1 %1533  ;;  %1653 = vadd.xlane.f32.xlu1 %v1652_v14  ;;  %v1540_v47 = vpop.xlane.xlu0 %1539  ;;  %v1730_v6 = vpack.c.bf16 %v4391_v30, %v4385_v36  ;;  %1644 = vadd.xlane.f32.xlu0 %v1643_v19  ;;  %v351_v14 = vpack.c.bf16 %v323_v17, %v323_v17  ;;  %v1697_v17 = vsel %vm1123_vm3, %v4360_v63, 0.0 }
 0x33f   :  { %v3401_v25 = vpop.eup %3400  ;;  %3410 = vpow2.f32 %v1494_v27  ;;  %v2341_v27 = vadd.s32 4294967248, %v4408_v3 }
 0x340   :  { %v2127_v41 = vsel %vm1123_vm3, %v1730_v6, 0  ;;  %v3403_v55 = vpop.eup %3402  ;;  %3412 = vrcp.f32 %v1516_v22  ;;  %v1682_v50 = vsel %vm1123_vm3, %v3401_v25, 0.0 }
 0x341   :  { %3235 = vmatpush3.bf16.xpose.msra.mxu1 %v2127_v41  ;;  %3414 = vrcp.f32 %v1510_v2  ;;  %v1661_v40 = vsel %vm1123_vm3, %v3403_v55, 0.0  ;;  %v1725_v31 = vpack.c.bf16 %v3403_v55, %v4356_v35  ;;  %v3405_v11 = vpop.eup %3404  ;;  %v2320_v2 = vadd.s32 4294967272, %v4408_v3 }
 0x342   :  { %v1528_v9 = vpop.xlane.xlu1 %1527  ;;  %v1513_v43 = vpop.xlane.xlu0 %1512  ;;  %3236 = vmatprep.subr.bf16.mxu1 %v4702_v28  ;;  %3416 = vrcp.f32 %v1519_v52  ;;  %1683 = vadd.xlane.f32.xlu0 %v1682_v50  ;;  %v1676_v10 = vsel %vm1123_vm3, %v3405_v11, 0.0  ;;  %v1664_v52 = vsel %vm1123_vm3, %v4372_v56, 0.0  ;;  %v1673_v55 = vsel %vm1123_vm3, %v4343_v4, 0.0 }
 0x343   :  { %1662 = vadd.xlane.f32.xlu1 %v1661_v40  ;;  %3418 = vrcp.f32 %v1513_v43  ;;  %v2069_v54 = vsel %vm1123_vm3, %v1725_v31, 0 }
 0x344   :  { %v3407_v62 = vpop.eup %3406  ;;  %3225 = vmatpush3.bf16.xpose.msra.mxu0 %v2069_v54  ;;  %3420 = vrcp.f32 %v1534_v44  ;;  %v2334_v44 = vadd.s32 4294967256, %v4408_v3 }
 0x345   :  { %v1729_v45 = vpack.c.bf16 %v3407_v62, %v3401_v25  ;;  %3226 = vmatprep.subr.bf16.mxu0 %v4702_v28 }
 0x346   :  { %v1522_v15 = vpop.xlane.xlu1 %1521  ;;  %v1543_v16 = vpop.xlane.xlu0 %1542  ;;  %v4460_v4 = vsub.s32 %v2334_v44, %v4417_v12  ;;  %v2706_v44 = vld [vmem:[%s4654_s4] sm:$0xff] }
 0x347   :  { %3422 = vrcp.f32 %v1522_v15  ;;  %1677 = vadd.xlane.f32.xlu1 %v1676_v10  ;;  %v2124_v0 = vsel %vm1123_vm3, %v1729_v45, 0  ;;  %v1667_v10 = vsel %vm1123_vm3, %v4376_v26, 0.0 }
 0x348   :  { %v3409_v13 = vpop.eup %3408  ;;  %3424 = vrcp.f32 %v1540_v47  ;;  %v4727_v47 = vld [vmem:[#allocation9_spill] sm:$0xff] }
 0x349   :  { %3426 = vrcp.f32 %v1528_v9  ;;  %3237 = vmatpush3.bf16.xpose.msra.mxu1 %v2124_v0  ;;  %v1655_v22 = vsel %vm1123_vm3, %v3409_v13, 0.0  ;;  %v1724_v49 = vpack.c.bf16 %v3409_v13, %v4388_v61  ;;  %v4440_v61 = vsub.s32 %v2320_v2, %v4417_v12 }
 0x34a   :  { %3428 = vrcp.f32 %v1543_v16  ;;  %v1525_v21 = vpop.xlane.xlu1 %1524  ;;  %1656 = vadd.xlane.f32.xlu0 %v1655_v22  ;;  %v1537_v35 = vpop.xlane.xlu0 %1536  ;;  %3238 = vmatprep.subr.bf16.mxu1 %v4702_v28  ;;  %v1685_v28 = vsel %vm1123_vm3, %v3407_v62, 0.0  ;;  %v326_v6 = vadd.f32 %v4727_v47, %v4263_v37  ;;  %v1694_v62 = vsel %vm1123_vm3, %v4353_v8, 0.0 }
 0x34b   :  { %3430 = vrcp.f32 %v1525_v21  ;;  %1671 = vadd.xlane.f32.xlu1 %v1670_v1  ;;  %v2066_v5 = vsel %vm1123_vm3, %v1724_v49, 0  ;;  %v4468_v0 = vsub.s32 %v2341_v27, %v4417_v12  ;;  %v1688_v21 = vsel %vm1123_vm3, %v4385_v36, 0.0 }
 0x34c   :  { %v3411_v24 = vpop.eup %3410  ;;  %3432 = vrcp.f32 %v1537_v35  ;;  %3227 = vmatpush3.bf16.xpose.msra.mxu0 %v2066_v5  ;;  %v352_v15 = vpack.c.bf16 %v326_v6, %v326_v6 }
 0x34d   :  { %v1728_v34 = vpack.c.bf16 %v3411_v24, %v3405_v11  ;;  %v3413_v48 = vpop.eup %3412  ;;  %v1679_v19 = vsel %vm1123_vm3, %v3411_v24, 0.0 }
 0x34e   :  { %1686 = vadd.xlane.f32.xlu0 %v1685_v28  ;;  %v1552_v58 = vpop.xlane.xlu0 %1551  ;;  %v3415_v51 = vpop.eup %3414  ;;  %v2317_v40 = vrot.slane %v3413_v48, %v4436_v23  ;;  %v1625_v28 = vsel %vm1123_vm3, %v4246_v57, 0.0 }
 0x34f   :  { %1665 = vadd.xlane.f32.xlu1 %v1664_v52  ;;  %v2121_v59 = vsel %vm1123_vm3, %v1728_v34, 0  ;;  %v3417_v60 = vpop.eup %3416  ;;  %v2305_v25 = vrot.slane %v3415_v51, %v4428_v33  ;;  %v1691_v52 = vsel %vm1123_vm3, %v4391_v30, 0.0  ;;  %v1649_v30 = vsel %vm1123_vm3, %v4270_v42, 0.0  ;;  %v2709_v42 = vld [vmem:[%s4654_s4 + $0x18] sm:$0xff] }
 0x350   :  { %v3419_v56 = vpop.eup %3418  ;;  %v2324_v31 = vrot.slane %v3417_v60, %v4440_v61  ;;  %v1553_v60 = vsel %vm1123_vm3, %v4091_v20, 0.0  ;;  %v2708_v20 = vld [vmem:[%s4654_s4 + $0x10] sm:$0xff] }
 0x351   :  { %3239 = vmatpush3.bf16.xpose.msra.mxu1 %v2121_v59  ;;  %v2310_v41 = vrot.slane %v3419_v56, %v4431_v32  ;;  %v3421_v50 = vpop.eup %3420 }
 0x352   :  { %1680 = vadd.xlane.f32.xlu0 %v1679_v19  ;;  %v1546_v9 = vpop.xlane.xlu0 %1545  ;;  %v2358_v1 = vrot.slane %v3421_v50, %v4428_v33  ;;  %v1564_v19 = vpop.xlane.xlu1 %1563 }
 0x353   :  { %1674 = vadd.xlane.f32.xlu1 %v1673_v55  ;;  %v2312_v11 = vsel %vm2311_vm5, %v2310_v41, %v2305_v25  ;;  %3434 = vrcp.f32 %v1546_v9  ;;  %3229 = vmatmul.mubr.msk.bf16.vlgmr.msra.gmra.mxu0 %vm1123_vm3, %v351_v14  ;;  %v2707_v41 = vld [vmem:[%s4654_s4 + $0x8] sm:$0xff] }
 0x354   :  { %v3423_v43 = vpop.eup %3422  ;;  %v2319_v54 = vsel %vm2318_vm6, %v2317_v40, %v2312_v11  ;;  %3436 = vrcp.f32 %v1552_v58 }
 0x355   :  { %v3425_v37 = vpop.eup %3424  ;;  %v2331_v29 = vrot.slane %v3423_v43, %v4443_v53  ;;  %v2326_v13 = vsel %vm2325_vm7, %v2324_v31, %v2319_v54  ;;  %v3282_v43 = vld [vmem:[%s4653_s3] sm:$0xff]  }
 0x356   :  { %v3427_v45 = vpop.eup %3426  ;;  %1695 = vadd.xlane.f32.xlu0 %v1694_v62  ;;  %v1549_v16 = vpop.xlane.xlu0 %1548  ;;  %v2367_v24 = vrot.slane %v3425_v37, %v4436_v23  ;;  %3248 = vmatprep.mubr.msk.bf16.mxu0 %vm148_vm0, %v3282_v43 }
 0x357   :  { %v3429_v22 = vpop.eup %3428  ;;  %1668 = vadd.xlane.f32.xlu1 %v1667_v10  ;;  %v2333_v49 = vsel %vm2332_vm8, %v2331_v29, %v2326_v13  ;;  %3438 = vrcp.f32 %v1549_v16  ;;  %v2345_v5 = vrot.slane %v3427_v45, %v4468_v0  ;;  %v1558_v6 = vpop.xlane.xlu1 %1557 }
 0x358   :  { %v3431_v8 = vpop.eup %3430  ;;  %3241 = vmatmul.mubr.msk.bf16.vlgmr.msra.gmra.mxu1 %vm1123_vm3, %v352_v15  ;;  %v2372_v39 = vrot.slane %v3429_v22, %v4440_v61  ;;  %3440 = vrcp.f32 %v1564_v19 }
 0x359   :  { %v3433_v38 = vpop.eup %3432  ;;  %v2338_v26 = vrot.slane %v3431_v8, %v4460_v4  ;;  %3256 = vmatprep.mubr.msk.bf16.mxu1 %vm148_vm0, %v3282_v43 }
 0x35a   :  { %v2362_v35 = vrot.slane %v3433_v38, %v4431_v32  ;;  %1689 = vadd.xlane.f32.xlu0 %v1688_v21  ;;  %v1588_v47 = vpop.xlane.xlu0 %1587 }
 0x35b   :  { %1530 = vadd.xlane.f32.xlu1 %v1529_v18  ;;  %v2340_v2 = vsel %vm2339_vm9, %v2338_v26, %v2333_v49  ;;  %v1567_v55 = vpop.xlane.xlu1 %1566 }
 0x35c   :  { %v2363_v36 = vsel %vm2311_vm5, %v2362_v35, %v2358_v1  ;;  %v4486_v7 = vsel %vm2346_vm10, %v2345_v5, %v2340_v2 }
 0x35d   :  { %v2368_v46 = vsel %vm2318_vm6, %v2367_v24, %v2363_v36 }
 0x35e   :  { %1698 = vadd.xlane.f32.xlu0 %v1697_v17  ;;  %v2373_v34 = vsel %vm2325_vm7, %v2372_v39, %v2368_v46  ;;  %v1561_v25 = vpop.xlane.xlu0 %1560 }
 0x35f   :  { %1626 = vadd.xlane.f32.xlu1 %v1625_v28  ;;  %v1582_v50 = vpop.xlane.xlu1 %1581  ;;  %3442 = vrcp.f32 %v1561_v25 }
 0x360   :  { %v3435_v48 = vpop.eup %3434  ;;  %3444 = vrcp.f32 %v1558_v6 }
 0x361   :  { %v2377_v58 = vrot.slane %v3435_v48, %v4443_v53  ;;  %v3437_v51 = vpop.eup %3436 }
 0x362   :  { %1692 = vadd.xlane.f32.xlu0 %v1691_v52  ;;  %v2387_v27 = vrot.slane %v3437_v51, %v4468_v0  ;;  %v1591_v9 = vpop.xlane.xlu0 %1590 }
 0x363   :  { %v2378_v59 = vsel %vm2332_vm8, %v2377_v58, %v2373_v34  ;;  %v1576_v31 = vpop.xlane.xlu1 %1575 }
 0x364   :  { %v3439_v63 = vpop.eup %3438 }
 0x365   :  { %v2382_v57 = vrot.slane %v3439_v63, %v4460_v4  ;;  %v3441_v21 = vpop.eup %3440 }
 0x366   :  { %1554 = vadd.xlane.f32.xlu0 %v1553_v60  ;;  %v1585_v40 = vpop.xlane.xlu0 %1584  ;;  %v2406_v63 = vrot.slane %v3441_v21, %v4436_v23 }
 0x367   :  { %v2383_v56 = vsel %vm2339_vm9, %v2382_v57, %v2378_v59  ;;  %v1570_v29 = vpop.xlane.xlu1 %1569  ;;  %3446 = vrcp.f32 %v1585_v40 }
 0x368   :  { %v4506_v14 = vsel %vm2346_vm10, %v2387_v27, %v2383_v56  ;;  %3448 = vrcp.f32 %v1567_v55 }
 0x369   :  { %3450 = vrcp.f32 %v1582_v50 }
 0x36a   :  { %1650 = vadd.xlane.f32.xlu0 %v1649_v30  ;;  %v1600_v11 = vpop.xlane.xlu0 %1599  ;;  %3452 = vrcp.f32 %v1588_v47  ;;  %v2348_v47 = vadd.s32 4294967240, %v4408_v3 }
 0x36b   :  { %v1579_v10 = vpop.xlane.xlu1 %1578  ;;  %3454 = vrcp.f32 %v1570_v29 }
 0x36c   :  { %3456 = vrcp.f32 %v1591_v9  ;;  %v3443_v35 = vpop.eup %3442 }
 0x36d   :  { %v3445_v18 = vpop.eup %3444  ;;  %v2401_v2 = vrot.slane %v3443_v35, %v4431_v32 }
 0x36e   :  { %v1594_v54 = vpop.xlane.xlu0 %1593  ;;  %v2397_v46 = vrot.slane %v3445_v18, %v4428_v33 }
 0x36f   :  { %v1573_v22 = vpop.xlane.xlu1 %1572 }
 0x370   :  { %2712 = vperm.xlu1 %3275, %v2706_v44   ;;  %3458 = vrcp.f32 %v1573_v22  ;;  %v2402_v51 = vsel %vm2311_vm5, %v2401_v2, %v2397_v46 }
 0x371   :  { %3460 = vrcp.f32 %v1594_v54  ;;  %v2407_v30 = vsel %vm2318_vm6, %v2406_v63, %v2402_v51 }
 0x372   :  { %v1603_v16 = vpop.xlane.xlu0 %1602 }
 0x373   :  { %v1612_v1 = vpop.xlane.xlu1 %1611 }
 0x374   :  { %2722 = vperm.xlu1 %3275, %v2708_v20   ;;  %v3447_v5 = vpop.eup %3446 }
 0x375   :  { %v3449_v24 = vpop.eup %3448  ;;  %v2440_v28 = vrot.slane %v3447_v5, %v4431_v32 }
 0x376   :  { %v1597_v8 = vpop.xlane.xlu0 %1596  ;;  %v3451_v36 = vpop.eup %3450  ;;  %v2411_v44 = vrot.slane %v3449_v24, %v4440_v61 }
 0x377   :  { %3462 = vrcp.f32 %v1597_v8  ;;  %v3453_v17 = vpop.eup %3452  ;;  %v2436_v52 = vrot.slane %v3451_v36, %v4428_v33 }
 0x378   :  { %2727 = vperm.xlu1 %3275, %v2709_v42   ;;  %3464 = vrcp.f32 %v1576_v31  ;;  %v3455_v34 = vpop.eup %3454  ;;  %v2445_v56 = vrot.slane %v3453_v17, %v4436_v23  ;;  %v2412_v55 = vsel %vm2325_vm7, %v2411_v44, %v2407_v30 }
 0x379   :  { %3466 = vrcp.f32 %v1600_v11  ;;  %v3457_v48 = vpop.eup %3456  ;;  %v2441_v57 = vsel %vm2311_vm5, %v2440_v28, %v2436_v52  ;;  %v2416_v42 = vrot.slane %v3455_v34, %v4443_v53 }
 0x37a   :  { %3468 = vrcp.f32 %v1579_v10  ;;  %v1636_v19 = vpop.xlane.xlu0 %1635  ;;  %v2446_v6 = vsel %vm2318_vm6, %v2445_v56, %v2441_v57 }
 0x37b   :  { %3470 = vrcp.f32 %v1603_v16  ;;  %v2417_v29 = vsel %vm2332_vm8, %v2416_v42, %v2412_v55 }
 0x37c   :  { %3472 = vrcp.f32 %v1612_v1 }
 0x37d   :  { %v3459_v59 = vpop.eup %3458 }
 0x37e   :  { %v3461_v60 = vpop.eup %3460  ;;  %v2421_v9 = vrot.slane %v3459_v59, %v4460_v4 }
 0x37f   :  { %v2455_v25 = vrot.slane %v3461_v60, %v4443_v53 }
 0x380   :  { %2717 = vperm.xlu0 %3274, %v2707_v41   ;;  %v2450_v41 = vrot.slane %v3457_v48, %v4440_v61  ;;  %v2422_v10 = vsel %vm2339_vm9, %v2421_v9, %v2417_v29 }
 0x382   :  { %v2451_v11 = vsel %vm2325_vm7, %v2450_v41, %v2446_v6 }
 0x383   :  { %v2456_v54 = vsel %vm2332_vm8, %v2455_v25, %v2451_v11 }
 0x384   :  { %v3463_v27 = vpop.eup %3462 }
 0x385   :  { %v2460_v50 = vrot.slane %v3463_v27, %v4460_v4  ;;  %v3465_v40 = vpop.eup %3464 }
 0x386   :  { %v3467_v43 = vpop.eup %3466  ;;  %v2426_v8 = vrot.slane %v3465_v40, %v4468_v0 }
 0x387   :  { %v2461_v22 = vsel %vm2339_vm9, %v2460_v50, %v2456_v54 }
 0x388   :  { %v2427_v1 = vsel %vm2346_vm10, %v2426_v8, %v2422_v10 }
 0x38e   :  { %v4525_v37 = vpop.f32.mrf.mxu0 }
 0x390   :  { %v3158_v62 = vpop.f32.mrf.mxu0 }
 0x392   :  { %v1784_v45 = vpop.f32.mrf.mxu0 }
 0x393   :  { %v3469_v45 = vpop.eup %3468 }
 0x394   :  { %v3159_v15 = vpop.f32.mrf.mxu0 }
 0x395   :  { %v4551_v15 = vsub.s32 %v2348_v47, %v4417_v12 }
 0x397   :  { %v2431_v18 = vrot.slane %v3469_v45, %v4551_v15 }
 0x399   :  { %v2432_v2 = vsel %vm2353_vm11, %v2431_v18, %v2427_v1 }
 0x39a   :  { %v4527_v13 = vpop.f32.mrf.mxu1 }
 0x39c   :  { %v3170_v49 = vpop.f32.mrf.mxu1 }
 0x39d   :  { %v3471_v49 = vpop.eup %3470 }
 0x39e   :  { %v1839_v38 = vpop.f32.mrf.mxu1  ;;  %v2470_v24 = vrot.slane %v3471_v49, %v4551_v15 }
 0x39f   :  { %v2465_v38 = vrot.slane %v3467_v43, %v4468_v0 }
 0x3a0   :  { %v3171_v26 = vpop.f32.mrf.mxu1 }
 0x3a1   :  { %v2466_v35 = vsel %vm2346_vm10, %v2465_v38, %v2461_v22 }
 0x3a2   :  { %v2471_v36 = vsel %vm2353_vm11, %v2470_v24, %v2466_v35 }
 0x3a7   :  { %v1606_v39 = vpop.xlane.xlu1 %1605 }
 0x3a8   :  { %3474 = vrcp.f32 %v1606_v39 }
 0x3ab   :  { %v1615_v58 = vpop.xlane.xlu1 %1614 }
 0x3ac   :  { %3476 = vrcp.f32 %v1615_v58  ;;  %v3473_v58 = vpop.eup %3472 }
 0x3af   :  { %v1630_v20 = vpop.xlane.xlu1 %1629 }
 0x3b2   :  { %v1891_v31 = vpop.f32.mrf.mxu0 }
 0x3b3   :  { %v1624_v3 = vpop.xlane.xlu1 %1623  ;;  %v1609_v62 = vpop.xlane.xlu0 %1608  ;;  %v2692_v46 = vmul.f32 %v2432_v2, %v1891_v31 }
 0x3b4   :  { %3478 = vrcp.f32 %v1609_v62  ;;  %v3182_v16 = vpop.f32.mrf.mxu0 }
 0x3b5   :  { %3480 = vrcp.f32 %v1636_v19  ;;  %v3475_v59 = vpop.eup %3474  ;;  %v2484_v19 = vrot.slane %v3473_v58, %v4436_v23 }
 0x3b6   :  { %v1894_v26 = vpop.f32.mrf.mxu0  ;;  %v2475_v56 = vrot.slane %v3475_v59, %v4428_v33 }
 0x3b7   :  { %v1618_v21 = vpop.xlane.xlu1 %1617  ;;  %v1639_v12 = vpop.xlane.xlu0 %1638 }
 0x3b8   :  { %3482 = vrcp.f32 %v1618_v21  ;;  %v3183_v5 = vpop.f32.mrf.mxu0 }
 0x3b9   :  { %3484 = vrcp.f32 %v1630_v20  ;;  %v3477_v60 = vpop.eup %3476 }
 0x3ba   :  { %3486 = vrcp.f32 %v1624_v3  ;;  %v1946_v39 = vpop.f32.mrf.mxu1  ;;  %v2489_v6 = vrot.slane %v3477_v60, %v4440_v61 }
 0x3bb   :  { %3488 = vrcp.f32 %v1639_v12  ;;  %v1621_v17 = vpop.xlane.xlu1 %1620  ;;  %v2693_v28 = vmul.f32 %v2471_v36, %v1946_v39  ;;  %v1633_v34 = vpop.xlane.xlu0 %1632 }
 0x3bc   :  { %3490 = vrcp.f32 %v1621_v17  ;;  %v3194_v48 = vpop.f32.mrf.mxu1 }
 0x3bd   :  { %3492 = vrcp.f32 %v1633_v34  ;;  %v2699_v52 = vpack.c.bf16 %v2693_v28, %v2692_v46 }
 0x3be   :  { %v1949_v51 = vpop.f32.mrf.mxu1 }
 0x3bf   :  { %3244 = vmatprep.subr.bf16.mxu0 %v2699_v52  ;;  %v1648_v63 = vpop.xlane.xlu0 %1647  ;;  %v1660_v44 = vpop.xlane.xlu1 %1659 }
 0x3c0   :  { %v3195_v57 = vpop.f32.mrf.mxu1  ;;  %3245 = vmatpush3.bf16.msra.mxu0 %v2699_v52 }
 0x3c1   :  { %v3479_v27 = vpop.eup %3478 }
 0x3c2   :  { %v2479_v30 = vrot.slane %v3479_v27, %v4431_v32  ;;  %v3481_v20 = vpop.eup %3480 }
 0x3c3   :  { %v1642_v47 = vpop.xlane.xlu0 %1641  ;;  %v2523_v22 = vrot.slane %v3481_v20, %v4436_v23 }
 0x3c4   :  { %3494 = vrcp.f32 %v1642_v47  ;;  %v2480_v25 = vsel %vm2311_vm5, %v2479_v30, %v2475_v56 }
 0x3c5   :  { %v3483_v42 = vpop.eup %3482  ;;  %v2485_v55 = vsel %vm2318_vm6, %v2484_v19, %v2480_v25  ;;  %3496 = vrcp.f32 %v1648_v63 }
 0x3c6   :  { %v3485_v41 = vpop.eup %3484  ;;  %v2490_v40 = vsel %vm2325_vm7, %v2489_v6, %v2485_v55  ;;  %v2494_v43 = vrot.slane %v3483_v42, %v4443_v53 }
 0x3c7   :  { %v3487_v9 = vpop.eup %3486  ;;  %v1654_v50 = vpop.xlane.xlu1 %1653  ;;  %v2514_v54 = vrot.slane %v3485_v41, %v4428_v33 }
 0x3c8   :  { %v3489_v31 = vpop.eup %3488  ;;  %v1645_v3 = vpop.xlane.xlu0 %1644  ;;  %v2495_v10 = vsel %vm2332_vm8, %v2494_v43, %v2490_v40  ;;  %v2504_v16 = vrot.slane %v3487_v9, %v4468_v0 }
 0x3c9   :  { %v3491_v11 = vpop.eup %3490  ;;  %3498 = vrcp.f32 %v1645_v3  ;;  %v2528_v38 = vrot.slane %v3489_v31, %v4440_v61 }
 0x3ca   :  { %v3493_v29 = vpop.eup %3492  ;;  %v2499_v62 = vrot.slane %v3491_v11, %v4460_v4 }
 0x3cb   :  { %v2518_v45 = vrot.slane %v3493_v29, %v4431_v32 }
 0x3cc   :  { %v1663_v49 = vpop.xlane.xlu1 %1662  ;;  %v2500_v8 = vsel %vm2339_vm9, %v2499_v62, %v2495_v10  ;;  %v1684_v12 = vpop.xlane.xlu0 %1683 }
 0x3cd   :  { %v4580_v26 = vsel %vm2346_vm10, %v2504_v16, %v2500_v8  ;;  %v2519_v21 = vsel %vm2311_vm5, %v2518_v45, %v2514_v54 }
 0x3ce   :  { %v2524_v1 = vsel %vm2318_vm6, %v2523_v22, %v2519_v21 }
 0x3cf   :  { %v2529_v35 = vsel %vm2325_vm7, %v2528_v38, %v2524_v1 }
 0x3d0   :  { %v1678_v18 = vpop.xlane.xlu1 %1677 }
 0x3d1   :  { %v3495_v5 = vpop.eup %3494 }
 0x3d2   :  { %v2533_v39 = vrot.slane %v3495_v5, %v4443_v53  ;;  %v3497_v36 = vpop.eup %3496 }
 0x3d3   :  { %v1657_v24 = vpop.xlane.xlu0 %1656  ;;  %v2543_v52 = vrot.slane %v3497_v36, %v4468_v0 }
 0x3d4   :  { %v1672_v2 = vpop.xlane.xlu1 %1671  ;;  %v2534_v48 = vsel %vm2332_vm8, %v2533_v39, %v2529_v35 }
 0x3d6   :  { %v3499_v17 = vpop.eup %3498 }
 0x3d7   :  { %v1687_v46 = vpop.xlane.xlu0 %1686  ;;  %v2538_v28 = vrot.slane %v3499_v17, %v4460_v4 }
 0x3d8   :  { %v1666_v34 = vpop.xlane.xlu1 %1665 }
 0x3d9   :  { %v2539_v58 = vsel %vm2339_vm9, %v2538_v28, %v2534_v48 }
 0x3da   :  { %v2544_v51 = vsel %vm2346_vm10, %v2543_v52, %v2539_v58 }
 0x3db   :  { %v1681_v59 = vpop.xlane.xlu0 %1680 }
 0x3dc   :  { %v1675_v63 = vpop.xlane.xlu1 %1674 }
 0x3df   :  { %v1696_v60 = vpop.xlane.xlu0 %1695 }
 0x3e0   :  { %v1669_v57 = vpop.xlane.xlu1 %1668 }
 0x3e3   :  { %v1690_v27 = vpop.xlane.xlu0 %1689 }
 0x3e4   :  { %v1531_v56 = vpop.xlane.xlu1 %1530 }
 0x3e5   :  { %3500 = vrcp.f32 %v1531_v56 }
 0x3e7   :  { %v1699_v30 = vpop.xlane.xlu0 %1698 }
 0x3e8   :  { %v1627_v20 = vpop.xlane.xlu1 %1626 }
 0x3e9   :  { %3502 = vrcp.f32 %v1627_v20 }
 0x3eb   :  { %v1693_v19 = vpop.xlane.xlu0 %1692 }
 0x3ef   :  { %v1555_v47 = vpop.xlane.xlu0 %1554 }
 0x3f0   :  { %3504 = vrcp.f32 %v1555_v47 }
 0x3f1   :  { %3506 = vrcp.f32 %v1660_v44 }
 0x3f2   :  { %3508 = vrcp.f32 %v1657_v24  ;;  %v3501_v41 = vpop.eup %3500 }
 0x3f3   :  { %v1651_v42 = vpop.xlane.xlu0 %1650  ;;  %v2001_v6 = vpop.f32.mrf.mxu0  ;;  %v2352_v31 = vrot.slane %v3501_v41, %v4551_v15 }
 0x3f4   :  { %3510 = vrcp.f32 %v1651_v42 }
 0x3f5   :  { %3512 = vrcp.f32 %v1654_v50  ;;  %v3206_v25 = vpop.f32.mrf.mxu0  ;;  %v2354_v62 = vsel %vm2353_vm11, %v2352_v31, %v4486_v7 }
 0x3f6   :  { %3514 = vrcp.f32 %v1681_v59  ;;  %v3503_v3 = vpop.eup %3502 }
 0x3f7   :  { %3516 = vrcp.f32 %v1663_v49  ;;  %v2004_v55 = vpop.f32.mrf.mxu0  ;;  %v2056_v9 = vpop.f32.mrf.mxu1  ;;  %v2509_v50 = vrot.slane %v3503_v3, %v4551_v15  ;;  %v2690_v49 = vmul.f32 %v2354_v62, %v4525_v37 }
 0x3f8   :  { %3518 = vrcp.f32 %v1678_v18 }
 0x3f9   :  { %3520 = vrcp.f32 %v1684_v12  ;;  %v3207_v40 = vpop.f32.mrf.mxu0  ;;  %v3218_v43 = vpop.f32.mrf.mxu1  ;;  %v2510_v21 = vsel %vm2353_vm11, %v2509_v50, %v4580_v26 }
 0x3fa   :  { %3522 = vrcp.f32 %v1687_v46  ;;  %v2694_v37 = vmul.f32 %v2510_v21, %v2001_v6 }
 0x3fb   :  { %3524 = vrcp.f32 %v1666_v34  ;;  %v2059_v44 = vpop.f32.mrf.mxu1 }
 0x3fc   :  { %3526 = vrcp.f32 %v1669_v57 }
 0x3fd   :  { %v3505_v11 = vpop.eup %3504  ;;  %3528 = vrcp.f32 %v1690_v27  ;;  %v3219_v29 = vpop.f32.mrf.mxu1 }
 0x3fe   :  { %3530 = vrcp.f32 %v1693_v19  ;;  %v2392_v54 = vrot.slane %v3505_v11, %v4551_v15  ;;  %v3507_v45 = vpop.eup %3506 }
 0x3ff   :  { %v3509_v10 = vpop.eup %3508  ;;  %3532 = vrcp.f32 %v1672_v2  ;;  %v2562_v52 = vrot.slane %v3507_v45, %v4436_v23 }
 0x400   :  { %v2393_v16 = vsel %vm2353_vm11, %v2392_v54, %v4506_v14  ;;  %3534 = vrcp.f32 %v1696_v60  ;;  %v2557_v18 = vrot.slane %v3509_v10, %v4431_v32 }
 0x401   :  { %v3511_v22 = vpop.eup %3510  ;;  %v2691_v8 = vmul.f32 %v2393_v16, %v4527_v13  ;;  %3536 = vrcp.f32 %v1675_v63  ;;  %v3283_v13 = vld [vmem:[%s4653_s3 + $0x8] sm:$0xff]   ;;  %s3565_s3 = smov [#allocation2]  }
 0x402   :  { %v3513_v38 = vpop.eup %3512  ;;  %v2548_v1 = vrot.slane %v3511_v22, %v4551_v15  ;;  %3538 = vrcp.f32 %v1699_v30  ;;  %s2857_s27 = sshll.u32 %s3565_s3, 4  ;;  %s2858_s27 = int_to_ptr.vmem [resolvable:$true] %s2857_s27 }
 0x403   :  { %v3515_v7 = vpop.eup %3514  ;;  %v2698_v12 = vpack.c.bf16 %v2691_v8, %v2690_v49  ;;  %v2553_v2 = vrot.slane %v3513_v38, %v4428_v33  ;;  %s3540_s28 = scalar_lea.vmem %s2858_s27, 1024  ;;  %p3545_p1 = scmp.lt.s32.totalorder %s2858_s27, %s2858_s27 }
 0x404   :  { %v3517_v35 = vpop.eup %3516  ;;  %v2549_v14 = vsel %vm2353_vm11, %v2548_v1, %v2544_v51  ;;  %v2596_v39 = vrot.slane %v3515_v7, %v4431_v32  ;;  %p3541_p0 = scmp.ne.s32.totalorder %s2858_s27, %s3540_s28  ;;  %p3546_p2 = scmp.lt.s32.totalorder %s3540_s28, %s3540_s28 }
 0x405   :  { %v3519_v5 = vpop.eup %3518  ;;  %v2695_v24 = vmul.f32 %v2549_v14, %v2056_v9  ;;  %3246 = vmatprep.subr.bf16.mxu0 %v2698_v12  ;;  %v2558_v34 = vsel %vm2311_vm5, %v2557_v18, %v2553_v2  ;;  %v2567_v60 = vrot.slane %v3517_v35, %v4440_v61 }
 0x406   :  { %v3521_v26 = vpop.eup %3520  ;;  %3247 = vmatpush3.bf16.msra.mxu0 %v2698_v12  ;;  %v2592_v28 = vrot.slane %v3519_v5, %v4428_v33  ;;  %v2563_v63 = vsel %vm2318_vm6, %v2562_v52, %v2558_v34  ;;  %v2718_v5 = vpop.permute.xlu0 %2717  ;;  %p3547_p3 = por %p3546_p2, %p3545_p1 }
 0x407   :  { %v3523_v36 = vpop.eup %3522  ;;  %v2700_v17 = vpack.c.bf16 %v2695_v24, %v2694_v37  ;;  %v2601_v32 = vrot.slane %v3521_v26, %v4436_v23  ;;  %v2568_v30 = vsel %vm2325_vm7, %v2567_v60, %v2563_v63 }
 0x408   :  { %v3525_v46 = vpop.eup %3524  ;;  %v2597_v51 = vsel %vm2311_vm5, %v2596_v39, %v2592_v28  ;;  %v2606_v56 = vrot.slane %v3523_v36, %v4440_v61  ;;  %p3548_p4 = pnand %p3547_p3, %p3541_p0 }
 0x409   :  { %v3527_v48 = vpop.eup %3526  ;;  %3249 = vmatmul.mubr.msk.bf16.vlgmr.msra.gmra.mxu0 %vm148_vm0, %v3283_v13  ;;  %v2572_v57 = vrot.slane %v3525_v46, %v4443_v53  ;;  %v2602_v33 = vsel %vm2318_vm6, %v2601_v32, %v2597_v51 }
 0x40a   :  { %v3529_v58 = vpop.eup %3528  ;;  %v2577_v20 = vrot.slane %v3527_v48, %v4460_v4  ;;  %v2607_v42 = vsel %vm2325_vm7, %v2606_v56, %v2602_v33 }
 0x40b   :  { %v3531_v59 = vpop.eup %3530  ;;  %v2611_v27 = vrot.slane %v3529_v58, %v4443_v53  ;;  %v2573_v6 = vsel %vm2332_vm8, %v2572_v57, %v2568_v30 }
 0x40c   :  { %v2616_v19 = vrot.slane %v3531_v59, %v4460_v4  ;;  %v3533_v47 = vpop.eup %3532  ;;  %v2578_v55 = vsel %vm2339_vm9, %v2577_v20, %v2573_v6 }
 0x40d   :  { %v3535_v23 = vpop.eup %3534  ;;  %v2612_v25 = vsel %vm2332_vm8, %v2611_v27, %v2607_v42  ;;  %v2582_v9 = vrot.slane %v3533_v47, %v4468_v0 }
 0x40e   :  { %v3537_v41 = vpop.eup %3536  ;;  %v2617_v53 = vsel %vm2339_vm9, %v2616_v19, %v2612_v25  ;;  %v2621_v40 = vrot.slane %v3535_v23, %v4468_v0 }
 0x40f   :  { %v3539_v61 = vpop.eup %3538  ;;  %v2583_v4 = vsel %vm2346_vm10, %v2582_v9, %v2578_v55  ;;  %v2587_v3 = vrot.slane %v3537_v41, %v4551_v15 }
 0x410   :  { %v2622_v31 = vsel %vm2346_vm10, %v2621_v40, %v2617_v53  ;;  %v2626_v11 = vrot.slane %v3539_v61, %v4551_v15  ;;  %v2713_v15 = vpop.permute.xlu1 %2712 }
 0x411   :  { %v2588_v50 = vsel %vm2353_vm11, %v2587_v3, %v2583_v4 }
 0x412   :  { %v2627_v54 = vsel %vm2353_vm11, %v2626_v11, %v2622_v31 }
 0x413   :  { %v2111_v43 = vpop.f32.mrf.mxu0 }
 0x414   :  { %v2696_v45 = vmul.f32 %v2588_v50, %v2111_v43  ;;  %v2723_v38 = vpop.permute.xlu1 %2722 }
 0x415   :  { %v3230_v44 = vpop.f32.mrf.mxu0 }
 0x417   :  { %v2114_v29 = vpop.f32.mrf.mxu0 }
 0x418   :  { %v2166_v62 = vpop.f32.mrf.mxu1  ;;  %v2728_v35 = vpop.permute.xlu1 %2727 }
 0x419   :  { %v2697_v10 = vmul.f32 %v2627_v54, %v2166_v62  ;;  %v3231_v16 = vpop.f32.mrf.mxu0 }
 0x41a   :  { %v3242_v0 = vpop.f32.mrf.mxu1 }
 0x41b   :  { %v2701_v22 = vpack.c.bf16 %v2697_v10, %v2696_v45 }
 0x41c   :  { %v2169_v49 = vpop.f32.mrf.mxu1 }
 0x41d   :  { %3252 = vmatprep.subr.bf16.mxu1 %v2701_v22 }
 0x41e   :  { %v3243_v8 = vpop.f32.mrf.mxu1  ;;  %3253 = vmatpush3.bf16.msra.mxu1 %v2701_v22 }
 0x41f   :  { %3254 = vmatprep.subr.bf16.mxu1 %v2700_v17 }
 0x422   :  { %3255 = vmatpush3.bf16.msra.mxu1 %v2700_v17 }
 0x425   :  { %3257 = vmatmul.mubr.msk.bf16.vlgmr.msra.gmra.mxu1 %vm148_vm0, %v3283_v13 }
 0x4c9   :  { %v3250_v21 = vpop.f32.mrf.mxu0 }
 0x4ca   :  { %v2789_v1 = vadd.f32 %v3250_v21, %v2723_v38 }
 0x4cb   :  { %v2780_v7 = vpop.f32.mrf.mxu0 }
 0x4cc   :  { %2846 = vst.msk [vmem:[#allocation2 + $0x10] sm:$0xff] %vm1123_vm3, %v2789_v1  ;;  %v2781_v12 = vadd.f32 %v2780_v7, %v2713_v15 }
 0x4cd   :  { %v3251_v18 = vpop.f32.mrf.mxu0 }
 0x4ce   :  { %2844 = vst.msk [vmem:[#allocation2] sm:$0xff] %vm1123_vm3, %v2781_v12  ;;  %v2792_v14 = vadd.f32 %v3251_v18, %v2728_v35 }
 0x4cf   :  { %v2783_v37 = vpop.f32.mrf.mxu0 }
 0x4d0   :  { %2847 = vst.msk [vmem:[#allocation2 + $0x18] sm:$0xff] %vm1123_vm3, %v2792_v14  ;;  %v2784_v24 = vadd.f32 %v2783_v37, %v2718_v5 }
 0x4d2   :  { %2845 = vst.msk [vmem:[#allocation2 + $0x8] sm:$0xff] %vm1123_vm3, %v2784_v24 }
 0x4e5   :  { %v3258_v13 = vpop.f32.mrf.mxu1 }
 0x4e6   :  { %v2838_v26 = vadd.f32 %v3258_v13, %v2723_v38 }
 0x4e7   :  { %v2829_v2 = vpop.f32.mrf.mxu1 }
 0x4e8   :  { %2850 = vst.msk [vmem:[#allocation2 + $0x30] sm:$0xff] %vm1123_vm3, %v2838_v26  ;;  %v2830_v39 = vadd.f32 %v2829_v2, %v2713_v15 }
 0x4e9   :  { %v3259_v36 = vpop.f32.mrf.mxu1 }
 0x4ea   :  { %2848 = vst.msk [vmem:[#allocation2 + $0x20] sm:$0xff] %vm1123_vm3, %v2830_v39  ;;  %v2841_v17 = vadd.f32 %v3259_v36, %v2728_v35 }
 0x4eb   :  { %v2832_v46 = vpop.f32.mrf.mxu1 }
 0x4ec   :  { %2851 = vst.msk [vmem:[#allocation2 + $0x38] sm:$0xff] %vm1123_vm3, %v2841_v17  ;;  %v2833_v28 = vadd.f32 %v2832_v46, %v2718_v5 }
 0x4ee   :  { %2849 = vst.msk [vmem:[#allocation2 + $0x28] sm:$0xff] %vm1123_vm3, %v2833_v28 }
 0x4ef   :  { %3551 = shalt.err (!%p3548_p4)
}
 0x4f0   :  { %s3566_s29 = smov 128   ;;  %s3567_s30 = smov 8  }
 0x4f1   :  { %2863 = dma.vmem_to_hbm [thread:$0]  %s2858_s27, 1024, %s4655_s5, [#allocation3], %s3566_s29, %s3566_s29, %s3567_s30  }
 0x4f2   :  { %3560 = dma.done.wait [#allocation3], 1024  }
 0x4f3   :  { %3561 = vsyncadd [#allocation3], 4294966272 }
 0x4f4   :  { %2867 = vsyncpa [#allocation3], 1 }

</bundles_post_ra>
